<compile_context>
chip_gen: v7x
topology: tpu7x:2x2x1
jax: 0.10.0
libtpu: 0.0.40
codegen_flags: <defaults>
</compile_context>

<pallas_src>
import jax
import jax.numpy as jnp
from jax import lax
from jax.experimental import pallas as pl
from jax.experimental.pallas import tpu as pltpu


def _round_up(x, m):
    return ((x + m - 1) // m) * m


# ---------------------------------------------------------------------------
# Pallas kernel: one batch tile, full bidirectional GRU recurrence.
# ---------------------------------------------------------------------------
def bigru_kernel(
    x_ref,        # (T, B_TILE, E)   bf16, time-major embedded inputs
    wih_ref,      # (E, 6H)          bf16, [W_ih_f^T | W_ih_b^T], gate order [r z n]
    whh_ref,      # (2H, 6H)         bf16, block-diag [W_hh_f^T ; W_hh_b^T]
    gib_ref,      # (1, 6H)          f32,  b_ih + b_hh for r/z, b_ih for n (both dirs)
    bhn_ref,      # (1, 6H)          f32,  zeros except b_hn columns (both dirs)
    out_ref,      # (B_TILE, H)      f32,  max(h_fwd_final, h_bwd_final)
    gi_ref,       # scratch VMEM (T, B_TILE, 6H) f32
):
    T, B, E = x_ref.shape
    H6 = wih_ref.shape[1]
    H = H6 // 6

    # (1) Fused input projection for BOTH directions and ALL timesteps: one MXU pass.
    x = x_ref[...].reshape(T * B, E)                                   # bf16
    gi = jnp.dot(x, wih_ref[...], preferred_element_type=jnp.float32)  # (T*B, 6H) f32
    gi = gi + gib_ref[...]                                             # fold r/z/n biases once
    gi_ref[...] = gi.reshape(T, B, H6)

    whh = whh_ref[...]                                                  # (2H, 6H) bf16
    bhn = jnp.broadcast_to(bhn_ref[...], (B, H6))                       # hoisted out of loop

    # (2) Single time loop carrying (h_f, h_b); one fused hidden matmul per step.
    def step(i, carry):
        h_f, h_b = carry                                                # (B, H) f32 each
        h_cat = jnp.concatenate([h_f, h_b], axis=1)                     # (B, 2H)
        gh = jnp.dot(h_cat.astype(whh.dtype), whh,
                     preferred_element_type=jnp.float32) + bhn          # (B, 6H) f32

        g_f = gi_ref[i]                                                 # fwd gates: cols [0:3H]
        g_b = gi_ref[T - 1 - i]                                         # bwd gates: cols [3H:6H]

        # forward direction (processes t = i)
        r_f = jax.nn.sigmoid(g_f[:, 0:H] + gh[:, 0:H])
        z_f = jax.nn.sigmoid(g_f[:, H:2 * H] + gh[:, H:2 * H])
        n_f = jnp.tanh(g_f[:, 2 * H:3 * H] + r_f * gh[:, 2 * H:3 * H])
        h_f = (1.0 - z_f) * n_f + z_f * h_f

        # backward direction (processes t = T-1-i)
        r_b = jax.nn.sigmoid(g_b[:, 3 * H:4 * H] + gh[:, 3 * H:4 * H])
        z_b = jax.nn.sigmoid(g_b[:, 4 * H:5 * H] + gh[:, 4 * H:5 * H])
        n_b = jnp.tanh(g_b[:, 5 * H:6 * H] + r_b * gh[:, 5 * H:6 * H])
        h_b = (1.0 - z_b) * n_b + z_b * h_b
        return (h_f, h_b)

    h0 = jnp.zeros((B, H), jnp.float32)
    unroll = True if T <= 16 else 4
    h_f, h_b = lax.fori_loop(0, T, step, (h0, h0), unroll=unroll)

    # torch.max over the two directions of the final hidden state.
    out_ref[...] = jnp.maximum(h_f, h_b)


# ---------------------------------------------------------------------------
# Parameter handling (PyTorch layout -> fused kernel layout).
# ---------------------------------------------------------------------------
def init_params(key, vocab_size, emb_size, hid_size):
    """PyTorch-layout parameters: weight_ih (3H,E), weight_hh (3H,H), biases (3H,)."""
    ks = jax.random.split(key, 9)
    k = 1.0 / (hid_size ** 0.5)

    def unif(kk, shape):
        return jax.random.uniform(kk, shape, jnp.float32, -k, k)

    embed = 0.1 * jax.random.normal(ks[0], (vocab_size, emb_size), jnp.float32)
    embed = embed.at[0].set(0.0)  # padding_idx=0

    return {
        "embed": embed,
        "wih_f": unif(ks[1], (3 * hid_size, emb_size)),
        "whh_f": unif(ks[2], (3 * hid_size, hid_size)),
        "bih_f": unif(ks[3], (3 * hid_size,)),
        "bhh_f": unif(ks[4], (3 * hid_size,)),
        "wih_b": unif(ks[5], (3 * hid_size, emb_size)),
        "whh_b": unif(ks[6], (3 * hid_size, hid_size)),
        "bih_b": unif(ks[7], (3 * hid_size,)),
        "bhh_b": unif(ks[8], (3 * hid_size,)),
    }


def pack_params(p, mxu_dtype=jnp.bfloat16):
    """Build fused / pre-transposed kernel weights (done once, outside the hot path)."""
    H = p["whh_f"].shape[1]

    wih = jnp.concatenate([p["wih_f"].T, p["wih_b"].T], axis=1)          # (E, 6H)

    whh = jnp.zeros((2 * H, 6 * H), jnp.float32)
    whh = whh.at[0:H, 0:3 * H].set(p["whh_f"].T)                         # fwd block
    whh = whh.at[H:2 * H, 3 * H:6 * H].set(p["whh_b"].T)                 # bwd block

    def gate_bias(bih, bhh):
        b = bih + bhh                       # r,z: b_ih + b_hh folded
        return b.at[2 * H:3 * H].set(bih[2 * H:3 * H])   # n: only b_ih here

    def bhn_only(bhh):
        return jnp.zeros((3 * H,), jnp.float32).at[2 * H:3 * H].set(bhh[2 * H:3 * H])

    gi_bias = jnp.concatenate(
        [gate_bias(p["bih_f"], p["bhh_f"]), gate_bias(p["bih_b"], p["bhh_b"])]
    ).reshape(1, 6 * H)
    bhn = jnp.concatenate([bhn_only(p["bhh_f"]), bhn_only(p["bhh_b"])]).reshape(1, 6 * H)

    return {
        "embed": p["embed"].astype(mxu_dtype),   # gather directly in bf16 (halves x traffic)
        "wih": wih.astype(mxu_dtype),
        "whh": whh.astype(mxu_dtype),
        "gi_bias": gi_bias.astype(jnp.float32),
        "bhn": bhn.astype(jnp.float32),
    }


# ---------------------------------------------------------------------------
# Forward pass wrapper.
# ---------------------------------------------------------------------------
def base_encoder_forward(inp, packed, b_tile_max=256):
    """inp: int32 (..., seq_len); returns (B, 1, H), B = prod(inp.shape[:-1])."""
    seq_len = inp.shape[-1]
    tok = inp.reshape(-1, seq_len)                       # (B, T)  == inp.view(-1, inp.size(2))
    B, T = tok.shape
    E = packed["embed"].shape[1]
    H6 = packed["wih"].shape[1]
    H = H6 // 6

    # Embedding lookup, gathered time-major and in the MXU dtype.
    # Dropout(0.4): identity in eval mode.
    x_tm = jnp.take(packed["embed"], tok.T, axis=0)      # (T, B, E) bf16

    # Batch tiling: multiple of 16 rows (bf16 sublane packing), capped at b_tile_max.
    B_TILE = min(b_tile_max, _round_up(B, 16))
    B_pad = _round_up(B, B_TILE)
    if B_pad != B:
        x_tm = jnp.pad(x_tm, ((0, 0), (0, B_pad - B), (0, 0)))
    grid = (B_pad // B_TILE,)

    out = pl.pallas_call(
        bigru_kernel,
        out_shape=jax.ShapeDtypeStruct((B_pad, H), jnp.float32),
        grid_spec=pltpu.PrefetchScalarGridSpec(
            num_scalar_prefetch=0,
            grid=grid,
            in_specs=[
                pl.BlockSpec((T, B_TILE, E), lambda i: (0, i, 0)),   # x slab: tiled over batch
                pl.BlockSpec((E, H6), lambda i: (0, 0)),             # fused W_ih (resident)
                pl.BlockSpec((2 * H, H6), lambda i: (0, 0)),         # block-diag W_hh
                pl.BlockSpec((1, H6), lambda i: (0, 0)),             # folded gi bias
                pl.BlockSpec((1, H6), lambda i: (0, 0)),             # b_hn (n-gate only)
            ],
            out_specs=pl.BlockSpec((B_TILE, H), lambda i: (i, 0)),
            scratch_shapes=[pltpu.VMEM((T, B_TILE, H6), jnp.float32)],
        ),
        compiler_params=pltpu.CompilerParams(
            dimension_semantics=("parallel",),           # batch tiles shard across TCs
            vmem_limit_bytes=32 * 1024 * 1024,
        ),
    )(x_tm, packed["wih"], packed["whh"], packed["gi_bias"], packed["bhn"])

    # x_hid[num_lyr-1].unsqueeze(0).transpose(0,1) -> (B, 1, H)
    return out[:B].reshape(B, 1, H)


# ---------------------------------------------------------------------------
# Pure-JAX (f32) reference, PyTorch layout — used for a loose numerical check.
# ---------------------------------------------------------------------------
def _gru_direction_ref(x_seq, wih, whh, bih, bhh):
    B, T, E = x_seq.shape
    H = whh.shape[1]

    def step(h, x_t):
        gi = x_t @ wih.T + bih
        gh = h @ whh.T + bhh
        r = jax.nn.sigmoid(gi[:, :H] + gh[:, :H])
        z = jax.nn.sigmoid(gi[:, H:2 * H] + gh[:, H:2 * H])
        n = jnp.tanh(gi[:, 2 * H:] + r * gh[:, 2 * H:])
        return (1.0 - z) * n + z * h, None

    h0 = jnp.zeros((B, H), jnp.float32)
    h, _ = lax.scan(step, h0, jnp.transpose(x_seq, (1, 0, 2)))
    return h


def base_encoder_ref(inp, params):
    tok = inp.reshape(-1, inp.shape[-1])
    x = jnp.take(params["embed"], tok, axis=0)
    h_f = _gru_direction_ref(x, params["wih_f"], params["whh_f"],
                             params["bih_f"], params["bhh_f"])
    h_b = _gru_direction_ref(x[:, ::-1], params["wih_b"], params["whh_b"],
                             params["bih_b"], params["bhh_b"])
    h = jnp.maximum(h_f, h_b)
    return h.reshape(h.shape[0], 1, h.shape[1])


if __name__ == "__main__":
    vocab_size, emb_size, hid_size = 50, 32, 32
    key = jax.random.PRNGKey(0)
    kp, kx = jax.random.split(key)

    params = init_params(kp, vocab_size, emb_size, hid_size)
    packed = pack_params(params)

    # inp: (num_dialogs=2, num_utts=4, seq_len=8) token ids -> B = 8
    inp = jax.random.randint(kx, (2, 4, 8), 0, vocab_size, dtype=jnp.int32)

    fwd = jax.jit(base_encoder_forward)
    out = jax.block_until_ready(fwd(inp, packed))

    assert out.shape == (8, 1, hid_size), out.shape
    assert bool(jnp.all(jnp.isfinite(out)))

    ref = base_encoder_ref(inp, params)
    max_err = float(jnp.max(jnp.abs(out - ref)))
    assert max_err < 5e-2, f"mismatch vs f32 reference: max abs err = {max_err}"

    print("KERNEL_OK")
</pallas_src>

<mosaic_0001>
module attributes {stable_mosaic.version = 11 : i64} {
  func.func @bigru_kernel(%arg0: i32, %arg1: memref<8x16x32xbf16, #tpu.memory_space<vmem>>, %arg2: memref<32x192xbf16, #tpu.memory_space<vmem>>, %arg3: memref<64x192xbf16, #tpu.memory_space<vmem>>, %arg4: memref<1x192xf32, #tpu.memory_space<vmem>>, %arg5: memref<1x192xf32, #tpu.memory_space<vmem>>, %arg6: memref<16x32xf32, #tpu.memory_space<vmem>>, %arg7: memref<8x16x192xf32, #tpu.memory_space<vmem>>) attributes {dimension_semantics = [#tpu.dimension_semantics<parallel>], iteration_bounds = array<i64: 1>, scalar_prefetch = 0 : i64, scratch_operands = 1 : i64, tpu.core_type = #tpu.core_type<tc>, window_params = [{transform_indices = @transform_0, window_bounds = array<i64: 8, 16, 32>}, {pipeline_mode = #tpu.pipeline_mode<synchronous>, transform_indices = @transform_1, window_bounds = array<i64: 32, 192>}, {pipeline_mode = #tpu.pipeline_mode<synchronous>, transform_indices = @transform_2, window_bounds = array<i64: 64, 192>}, {pipeline_mode = #tpu.pipeline_mode<synchronous>, transform_indices = @transform_3, window_bounds = array<i64: 1, 192>}, {pipeline_mode = #tpu.pipeline_mode<synchronous>, transform_indices = @transform_4, window_bounds = array<i64: 1, 192>}, {transform_indices = @transform_5, window_bounds = array<i64: 16, 32>}]} {
    %c0 = arith.constant 0 : index
    %c0_0 = arith.constant 0 : index
    %c0_1 = arith.constant 0 : index
    %0 = vector.load %arg1[%c0, %c0_0, %c0_1] : memref<8x16x32xbf16, #tpu.memory_space<vmem>>, vector<8x16x32xbf16>
    %1 = vector.shape_cast %0 : vector<8x16x32xbf16> to vector<128x32xbf16>
    %c0_2 = arith.constant 0 : index
    %c0_3 = arith.constant 0 : index
    %2 = vector.load %arg2[%c0_2, %c0_3] : memref<32x192xbf16, #tpu.memory_space<vmem>>, vector<32x192xbf16>
    %cst = arith.constant dense<0.000000e+00> : vector<128x192xf32>
    %3 = tpu.matmul %1, %2, %cst {dimension_numbers = #tpu.dot_dimension_numbers<[1], [0], [0], [1], [0, 0, 1, 1], [], []>} : vector<128x32xbf16>, vector<32x192xbf16>, vector<128x192xf32> -> vector<128x192xf32>
    %c0_4 = arith.constant 0 : index
    %c0_5 = arith.constant 0 : index
    %4 = vector.load %arg4[%c0_4, %c0_5] : memref<1x192xf32, #tpu.memory_space<vmem>>, vector<1x192xf32>
    %5 = vector.broadcast %4 : vector<1x192xf32> to vector<128x192xf32>
    %6 = arith.addf %3, %5 : vector<128x192xf32>
    %7 = vector.shape_cast %6 : vector<128x192xf32> to vector<8x16x192xf32>
    %c0_6 = arith.constant 0 : index
    %c0_7 = arith.constant 0 : index
    %c0_8 = arith.constant 0 : index
    %8 = vector.load %arg7[%c0_6, %c0_7, %c0_8] : memref<8x16x192xf32, #tpu.memory_space<vmem>>, vector<8x16x192xf32>
    tpu.vector_store %arg7[%c0_6, %c0_7, %c0_8], %7 {strides = array<i32>} : memref<8x16x192xf32, #tpu.memory_space<vmem>>, vector<8x16x192xf32>,
    %c0_9 = arith.constant 0 : index
    %c0_10 = arith.constant 0 : index
    %9 = vector.load %arg3[%c0_9, %c0_10] : memref<64x192xbf16, #tpu.memory_space<vmem>>, vector<64x192xbf16>
    %c0_11 = arith.constant 0 : index
    %c0_12 = arith.constant 0 : index
    %10 = vector.load %arg5[%c0_11, %c0_12] : memref<1x192xf32, #tpu.memory_space<vmem>>, vector<1x192xf32>
    %11 = vector.shape_cast %10 : vector<1x192xf32> to vector<1x192xf32>
    %12 = vector.broadcast %11 : vector<1x192xf32> to vector<16x192xf32>
    %cst_13 = arith.constant 0.000000e+00 : f32
    %13 = vector.broadcast %cst_13 : f32 to vector<16x32xf32>
    %c0_i32 = arith.constant 0 : i32
    %14 = tpu.concatenate %13, %13 in 1 : vector<16x32xf32>, vector<16x32xf32> -> vector<16x64xf32>
    %15 = arith.truncf %14 : vector<16x64xf32> to vector<16x64xbf16>
    %cst_14 = arith.constant dense<0.000000e+00> : vector<16x192xf32>
    %16 = tpu.matmul %15, %9, %cst_14 {dimension_numbers = #tpu.dot_dimension_numbers<[1], [0], [0], [1], [0, 0, 1, 1], [], []>} : vector<16x64xbf16>, vector<64x192xbf16>, vector<16x192xf32> -> vector<16x192xf32>
    %17 = arith.addf %16, %12 : vector<16x192xf32>
    %18 = arith.index_cast %c0_i32 : i32 to index
    %c0_15 = arith.constant 0 : index
    %c0_16 = arith.constant 0 : index
    %19 = vector.load %arg7[%18, %c0_15, %c0_16] : memref<8x16x192xf32, #tpu.memory_space<vmem>>, vector<1x16x192xf32>
    %20 = vector.shape_cast %19 : vector<1x16x192xf32> to vector<16x192xf32>
    %c7_i32 = arith.constant 7 : i32
    %21 = arith.subi %c7_i32, %c0_i32 : i32
    %22 = arith.index_cast %21 : i32 to index
    %c0_17 = arith.constant 0 : index
    %c0_18 = arith.constant 0 : index
    %23 = vector.load %arg7[%22, %c0_17, %c0_18] : memref<8x16x192xf32, #tpu.memory_space<vmem>>, vector<1x16x192xf32>
    %24 = vector.shape_cast %23 : vector<1x16x192xf32> to vector<16x192xf32>
    %25 = vector.extract_strided_slice %20 {offsets = [0, 0], sizes = [16, 32], strides = [1, 1]} : vector<16x192xf32> to vector<16x32xf32>
    %26 = vector.extract_strided_slice %17 {offsets = [0, 0], sizes = [16, 32], strides = [1, 1]} : vector<16x192xf32> to vector<16x32xf32>
    %27 = arith.addf %25, %26 : vector<16x32xf32>
    %28 = arith.negf %27 : vector<16x32xf32>
    %29 = math.exp %28 : vector<16x32xf32>
    %cst_19 = arith.constant 1.000000e+00 : f32
    %30 = vector.broadcast %cst_19 : f32 to vector<16x32xf32>
    %31 = arith.addf %30, %29 : vector<16x32xf32>
    %32 = arith.divf %30, %31 : vector<16x32xf32>
    %33 = vector.extract_strided_slice %20 {offsets = [0, 32], sizes = [16, 32], strides = [1, 1]} : vector<16x192xf32> to vector<16x32xf32>
    %34 = vector.extract_strided_slice %17 {offsets = [0, 32], sizes = [16, 32], strides = [1, 1]} : vector<16x192xf32> to vector<16x32xf32>
    %35 = arith.addf %33, %34 : vector<16x32xf32>
    %36 = arith.negf %35 : vector<16x32xf32>
    %37 = math.exp %36 : vector<16x32xf32>
    %cst_20 = arith.constant 1.000000e+00 : f32
    %38 = vector.broadcast %cst_20 : f32 to vector<16x32xf32>
    %39 = arith.addf %38, %37 : vector<16x32xf32>
    %40 = arith.divf %38, %39 : vector<16x32xf32>
    %41 = vector.extract_strided_slice %20 {offsets = [0, 64], sizes = [16, 32], strides = [1, 1]} : vector<16x192xf32> to vector<16x32xf32>
    %42 = vector.extract_strided_slice %17 {offsets = [0, 64], sizes = [16, 32], strides = [1, 1]} : vector<16x192xf32> to vector<16x32xf32>
    %43 = arith.mulf %32, %42 : vector<16x32xf32>
    %44 = arith.addf %41, %43 : vector<16x32xf32>
    %45 = math.tanh %44 : vector<16x32xf32>
    %cst_21 = arith.constant 1.000000e+00 : f32
    %46 = vector.broadcast %cst_21 : f32 to vector<16x32xf32>
    %47 = arith.subf %46, %40 : vector<16x32xf32>
    %48 = arith.mulf %47, %45 : vector<16x32xf32>
    %49 = arith.mulf %40, %13 : vector<16x32xf32>
    %50 = arith.addf %48, %49 : vector<16x32xf32>
    %51 = vector.extract_strided_slice %24 {offsets = [0, 96], sizes = [16, 32], strides = [1, 1]} : vector<16x192xf32> to vector<16x32xf32>
    %52 = vector.extract_strided_slice %17 {offsets = [0, 96], sizes = [16, 32], strides = [1, 1]} : vector<16x192xf32> to vector<16x32xf32>
    %53 = arith.addf %51, %52 : vector<16x32xf32>
    %54 = arith.negf %53 : vector<16x32xf32>
    %55 = math.exp %54 : vector<16x32xf32>
    %cst_22 = arith.constant 1.000000e+00 : f32
    %56 = vector.broadcast %cst_22 : f32 to vector<16x32xf32>
    %57 = arith.addf %56, %55 : vector<16x32xf32>
    %58 = arith.divf %56, %57 : vector<16x32xf32>
    %59 = vector.extract_strided_slice %24 {offsets = [0, 128], sizes = [16, 32], strides = [1, 1]} : vector<16x192xf32> to vector<16x32xf32>
    %60 = vector.extract_strided_slice %17 {offsets = [0, 128], sizes = [16, 32], strides = [1, 1]} : vector<16x192xf32> to vector<16x32xf32>
    %61 = arith.addf %59, %60 : vector<16x32xf32>
    %62 = arith.negf %61 : vector<16x32xf32>
    %63 = math.exp %62 : vector<16x32xf32>
    %cst_23 = arith.constant 1.000000e+00 : f32
    %64 = vector.broadcast %cst_23 : f32 to vector<16x32xf32>
    %65 = arith.addf %64, %63 : vector<16x32xf32>
    %66 = arith.divf %64, %65 : vector<16x32xf32>
    %67 = vector.extract_strided_slice %24 {offsets = [0, 160], sizes = [16, 32], strides = [1, 1]} : vector<16x192xf32> to vector<16x32xf32>
    %68 = vector.extract_strided_slice %17 {offsets = [0, 160], sizes = [16, 32], strides = [1, 1]} : vector<16x192xf32> to vector<16x32xf32>
    %69 = arith.mulf %58, %68 : vector<16x32xf32>
    %70 = arith.addf %67, %69 : vector<16x32xf32>
    %71 = math.tanh %70 : vector<16x32xf32>
    %cst_24 = arith.constant 1.000000e+00 : f32
    %72 = vector.broadcast %cst_24 : f32 to vector<16x32xf32>
    %73 = arith.subf %72, %66 : vector<16x32xf32>
    %74 = arith.mulf %73, %71 : vector<16x32xf32>
    %75 = arith.mulf %66, %13 : vector<16x32xf32>
    %76 = arith.addf %74, %75 : vector<16x32xf32>
    %c1_i32 = arith.constant 1 : i32
    %77 = tpu.concatenate %50, %76 in 1 : vector<16x32xf32>, vector<16x32xf32> -> vector<16x64xf32>
    %78 = arith.truncf %77 : vector<16x64xf32> to vector<16x64xbf16>
    %cst_25 = arith.constant dense<0.000000e+00> : vector<16x192xf32>
    %79 = tpu.matmul %78, %9, %cst_25 {dimension_numbers = #tpu.dot_dimension_numbers<[1], [0], [0], [1], [0, 0, 1, 1], [], []>} : vector<16x64xbf16>, vector<64x192xbf16>, vector<16x192xf32> -> vector<16x192xf32>
    %80 = arith.addf %79, %12 : vector<16x192xf32>
    %81 = arith.index_cast %c1_i32 : i32 to index
    %c0_26 = arith.constant 0 : index
    %c0_27 = arith.constant 0 : index
    %82 = vector.load %arg7[%81, %c0_26, %c0_27] : memref<8x16x192xf32, #tpu.memory_space<vmem>>, vector<1x16x192xf32>
    %83 = vector.shape_cast %82 : vector<1x16x192xf32> to vector<16x192xf32>
    %c7_i32_28 = arith.constant 7 : i32
    %84 = arith.subi %c7_i32_28, %c1_i32 : i32
    %85 = arith.index_cast %84 : i32 to index
    %c0_29 = arith.constant 0 : index
    %c0_30 = arith.constant 0 : index
    %86 = vector.load %arg7[%85, %c0_29, %c0_30] : memref<8x16x192xf32, #tpu.memory_space<vmem>>, vector<1x16x192xf32>
    %87 = vector.shape_cast %86 : vector<1x16x192xf32> to vector<16x192xf32>
    %88 = vector.extract_strided_slice %83 {offsets = [0, 0], sizes = [16, 32], strides = [1, 1]} : vector<16x192xf32> to vector<16x32xf32>
    %89 = vector.extract_strided_slice %80 {offsets = [0, 0], sizes = [16, 32], strides = [1, 1]} : vector<16x192xf32> to vector<16x32xf32>
    %90 = arith.addf %88, %89 : vector<16x32xf32>
    %91 = arith.negf %90 : vector<16x32xf32>
    %92 = math.exp %91 : vector<16x32xf32>
    %cst_31 = arith.constant 1.000000e+00 : f32
    %93 = vector.broadcast %cst_31 : f32 to vector<16x32xf32>
    %94 = arith.addf %93, %92 : vector<16x32xf32>
    %95 = arith.divf %93, %94 : vector<16x32xf32>
    %96 = vector.extract_strided_slice %83 {offsets = [0, 32], sizes = [16, 32], strides = [1, 1]} : vector<16x192xf32> to vector<16x32xf32>
    %97 = vector.extract_strided_slice %80 {offsets = [0, 32], sizes = [16, 32], strides = [1, 1]} : vector<16x192xf32> to vector<16x32xf32>
    %98 = arith.addf %96, %97 : vector<16x32xf32>
    %99 = arith.negf %98 : vector<16x32xf32>
    %100 = math.exp %99 : vector<16x32xf32>
    %cst_32 = arith.constant 1.000000e+00 : f32
    %101 = vector.broadcast %cst_32 : f32 to vector<16x32xf32>
    %102 = arith.addf %101, %100 : vector<16x32xf32>
    %103 = arith.divf %101, %102 : vector<16x32xf32>
    %104 = vector.extract_strided_slice %83 {offsets = [0, 64], sizes = [16, 32], strides = [1, 1]} : vector<16x192xf32> to vector<16x32xf32>
    %105 = vector.extract_strided_slice %80 {offsets = [0, 64], sizes = [16, 32], strides = [1, 1]} : vector<16x192xf32> to vector<16x32xf32>
    %106 = arith.mulf %95, %105 : vector<16x32xf32>
    %107 = arith.addf %104, %106 : vector<16x32xf32>
    %108 = math.tanh %107 : vector<16x32xf32>
    %cst_33 = arith.constant 1.000000e+00 : f32
    %109 = vector.broadcast %cst_33 : f32 to vector<16x32xf32>
    %110 = arith.subf %109, %103 : vector<16x32xf32>
    %111 = arith.mulf %110, %108 : vector<16x32xf32>
    %112 = arith.mulf %103, %50 : vector<16x32xf32>
    %113 = arith.addf %111, %112 : vector<16x32xf32>
    %114 = vector.extract_strided_slice %87 {offsets = [0, 96], sizes = [16, 32], strides = [1, 1]} : vector<16x192xf32> to vector<16x32xf32>
    %115 = vector.extract_strided_slice %80 {offsets = [0, 96], sizes = [16, 32], strides = [1, 1]} : vector<16x192xf32> to vector<16x32xf32>
    %116 = arith.addf %114, %115 : vector<16x32xf32>
    %117 = arith.negf %116 : vector<16x32xf32>
    %118 = math.exp %117 : vector<16x32xf32>
    %cst_34 = arith.constant 1.000000e+00 : f32
    %119 = vector.broadcast %cst_34 : f32 to vector<16x32xf32>
    %120 = arith.addf %119, %118 : vector<16x32xf32>
    %121 = arith.divf %119, %120 : vector<16x32xf32>
    %122 = vector.extract_strided_slice %87 {offsets = [0, 128], sizes = [16, 32], strides = [1, 1]} : vector<16x192xf32> to vector<16x32xf32>
    %123 = vector.extract_strided_slice %80 {offsets = [0, 128], sizes = [16, 32], strides = [1, 1]} : vector<16x192xf32> to vector<16x32xf32>
    %124 = arith.addf %122, %123 : vector<16x32xf32>
    %125 = arith.negf %124 : vector<16x32xf32>
    %126 = math.exp %125 : vector<16x32xf32>
    %cst_35 = arith.constant 1.000000e+00 : f32
    %127 = vector.broadcast %cst_35 : f32 to vector<16x32xf32>
    %128 = arith.addf %127, %126 : vector<16x32xf32>
    %129 = arith.divf %127, %128 : vector<16x32xf32>
    %130 = vector.extract_strided_slice %87 {offsets = [0, 160], sizes = [16, 32], strides = [1, 1]} : vector<16x192xf32> to vector<16x32xf32>
    %131 = vector.extract_strided_slice %80 {offsets = [0, 160], sizes = [16, 32], strides = [1, 1]} : vector<16x192xf32> to vector<16x32xf32>
    %132 = arith.mulf %121, %131 : vector<16x32xf32>
    %133 = arith.addf %130, %132 : vector<16x32xf32>
    %134 = math.tanh %133 : vector<16x32xf32>
    %cst_36 = arith.constant 1.000000e+00 : f32
    %135 = vector.broadcast %cst_36 : f32 to vector<16x32xf32>
    %136 = arith.subf %135, %129 : vector<16x32xf32>
    %137 = arith.mulf %136, %134 : vector<16x32xf32>
    %138 = arith.mulf %129, %76 : vector<16x32xf32>
    %139 = arith.addf %137, %138 : vector<16x32xf32>
    %c2_i32 = arith.constant 2 : i32
    %140 = tpu.concatenate %113, %139 in 1 : vector<16x32xf32>, vector<16x32xf32> -> vector<16x64xf32>
    %141 = arith.truncf %140 : vector<16x64xf32> to vector<16x64xbf16>
    %cst_37 = arith.constant dense<0.000000e+00> : vector<16x192xf32>
    %142 = tpu.matmul %141, %9, %cst_37 {dimension_numbers = #tpu.dot_dimension_numbers<[1], [0], [0], [1], [0, 0, 1, 1], [], []>} : vector<16x64xbf16>, vector<64x192xbf16>, vector<16x192xf32> -> vector<16x192xf32>
    %143 = arith.addf %142, %12 : vector<16x192xf32>
    %144 = arith.index_cast %c2_i32 : i32 to index
    %c0_38 = arith.constant 0 : index
    %c0_39 = arith.constant 0 : index
    %145 = vector.load %arg7[%144, %c0_38, %c0_39] : memref<8x16x192xf32, #tpu.memory_space<vmem>>, vector<1x16x192xf32>
    %146 = vector.shape_cast %145 : vector<1x16x192xf32> to vector<16x192xf32>
    %c7_i32_40 = arith.constant 7 : i32
    %147 = arith.subi %c7_i32_40, %c2_i32 : i32
    %148 = arith.index_cast %147 : i32 to index
    %c0_41 = arith.constant 0 : index
    %c0_42 = arith.constant 0 : index
    %149 = vector.load %arg7[%148, %c0_41, %c0_42] : memref<8x16x192xf32, #tpu.memory_space<vmem>>, vector<1x16x192xf32>
    %150 = vector.shape_cast %149 : vector<1x16x192xf32> to vector<16x192xf32>
    %151 = vector.extract_strided_slice %146 {offsets = [0, 0], sizes = [16, 32], strides = [1, 1]} : vector<16x192xf32> to vector<16x32xf32>
    %152 = vector.extract_strided_slice %143 {offsets = [0, 0], sizes = [16, 32], strides = [1, 1]} : vector<16x192xf32> to vector<16x32xf32>
    %153 = arith.addf %151, %152 : vector<16x32xf32>
    %154 = arith.negf %153 : vector<16x32xf32>
    %155 = math.exp %154 : vector<16x32xf32>
    %cst_43 = arith.constant 1.000000e+00 : f32
    %156 = vector.broadcast %cst_43 : f32 to vector<16x32xf32>
    %157 = arith.addf %156, %155 : vector<16x32xf32>
    %158 = arith.divf %156, %157 : vector<16x32xf32>
    %159 = vector.extract_strided_slice %146 {offsets = [0, 32], sizes = [16, 32], strides = [1, 1]} : vector<16x192xf32> to vector<16x32xf32>
    %160 = vector.extract_strided_slice %143 {offsets = [0, 32], sizes = [16, 32], strides = [1, 1]} : vector<16x192xf32> to vector<16x32xf32>
    %161 = arith.addf %159, %160 : vector<16x32xf32>
    %162 = arith.negf %161 : vector<16x32xf32>
    %163 = math.exp %162 : vector<16x32xf32>
    %cst_44 = arith.constant 1.000000e+00 : f32
    %164 = vector.broadcast %cst_44 : f32 to vector<16x32xf32>
    %165 = arith.addf %164, %163 : vector<16x32xf32>
    %166 = arith.divf %164, %165 : vector<16x32xf32>
    %167 = vector.extract_strided_slice %146 {offsets = [0, 64], sizes = [16, 32], strides = [1, 1]} : vector<16x192xf32> to vector<16x32xf32>
    %168 = vector.extract_strided_slice %143 {offsets = [0, 64], sizes = [16, 32], strides = [1, 1]} : vector<16x192xf32> to vector<16x32xf32>
    %169 = arith.mulf %158, %168 : vector<16x32xf32>
    %170 = arith.addf %167, %169 : vector<16x32xf32>
    %171 = math.tanh %170 : vector<16x32xf32>
    %cst_45 = arith.constant 1.000000e+00 : f32
    %172 = vector.broadcast %cst_45 : f32 to vector<16x32xf32>
    %173 = arith.subf %172, %166 : vector<16x32xf32>
    %174 = arith.mulf %173, %171 : vector<16x32xf32>
    %175 = arith.mulf %166, %113 : vector<16x32xf32>
    %176 = arith.addf %174, %175 : vector<16x32xf32>
    %177 = vector.extract_strided_slice %150 {offsets = [0, 96], sizes = [16, 32], strides = [1, 1]} : vector<16x192xf32> to vector<16x32xf32>
    %178 = vector.extract_strided_slice %143 {offsets = [0, 96], sizes = [16, 32], strides = [1, 1]} : vector<16x192xf32> to vector<16x32xf32>
    %179 = arith.addf %177, %178 : vector<16x32xf32>
    %180 = arith.negf %179 : vector<16x32xf32>
    %181 = math.exp %180 : vector<16x32xf32>
    %cst_46 = arith.constant 1.000000e+00 : f32
    %182 = vector.broadcast %cst_46 : f32 to vector<16x32xf32>
    %183 = arith.addf %182, %181 : vector<16x32xf32>
    %184 = arith.divf %182, %183 : vector<16x32xf32>
    %185 = vector.extract_strided_slice %150 {offsets = [0, 128], sizes = [16, 32], strides = [1, 1]} : vector<16x192xf32> to vector<16x32xf32>
    %186 = vector.extract_strided_slice %143 {offsets = [0, 128], sizes = [16, 32], strides = [1, 1]} : vector<16x192xf32> to vector<16x32xf32>
    %187 = arith.addf %185, %186 : vector<16x32xf32>
    %188 = arith.negf %187 : vector<16x32xf32>
    %189 = math.exp %188 : vector<16x32xf32>
    %cst_47 = arith.constant 1.000000e+00 : f32
    %190 = vector.broadcast %cst_47 : f32 to vector<16x32xf32>
    %191 = arith.addf %190, %189 : vector<16x32xf32>
    %192 = arith.divf %190, %191 : vector<16x32xf32>
    %193 = vector.extract_strided_slice %150 {offsets = [0, 160], sizes = [16, 32], strides = [1, 1]} : vector<16x192xf32> to vector<16x32xf32>
    %194 = vector.extract_strided_slice %143 {offsets = [0, 160], sizes = [16, 32], strides = [1, 1]} : vector<16x192xf32> to vector<16x32xf32>
    %195 = arith.mulf %184, %194 : vector<16x32xf32>
    %196 = arith.addf %193, %195 : vector<16x32xf32>
    %197 = math.tanh %196 : vector<16x32xf32>
    %cst_48 = arith.constant 1.000000e+00 : f32
    %198 = vector.broadcast %cst_48 : f32 to vector<16x32xf32>
    %199 = arith.subf %198, %192 : vector<16x32xf32>
    %200 = arith.mulf %199, %197 : vector<16x32xf32>
    %201 = arith.mulf %192, %139 : vector<16x32xf32>
    %202 = arith.addf %200, %201 : vector<16x32xf32>
    %c3_i32 = arith.constant 3 : i32
    %203 = tpu.concatenate %176, %202 in 1 : vector<16x32xf32>, vector<16x32xf32> -> vector<16x64xf32>
    %204 = arith.truncf %203 : vector<16x64xf32> to vector<16x64xbf16>
    %cst_49 = arith.constant dense<0.000000e+00> : vector<16x192xf32>
    %205 = tpu.matmul %204, %9, %cst_49 {dimension_numbers = #tpu.dot_dimension_numbers<[1], [0], [0], [1], [0, 0, 1, 1], [], []>} : vector<16x64xbf16>, vector<64x192xbf16>, vector<16x192xf32> -> vector<16x192xf32>
    %206 = arith.addf %205, %12 : vector<16x192xf32>
    %207 = arith.index_cast %c3_i32 : i32 to index
    %c0_50 = arith.constant 0 : index
    %c0_51 = arith.constant 0 : index
    %208 = vector.load %arg7[%207, %c0_50, %c0_51] : memref<8x16x192xf32, #tpu.memory_space<vmem>>, vector<1x16x192xf32>
    %209 = vector.shape_cast %208 : vector<1x16x192xf32> to vector<16x192xf32>
    %c7_i32_52 = arith.constant 7 : i32
    %210 = arith.subi %c7_i32_52, %c3_i32 : i32
    %211 = arith.index_cast %210 : i32 to index
    %c0_53 = arith.constant 0 : index
    %c0_54 = arith.constant 0 : index
    %212 = vector.load %arg7[%211, %c0_53, %c0_54] : memref<8x16x192xf32, #tpu.memory_space<vmem>>, vector<1x16x192xf32>
    %213 = vector.shape_cast %212 : vector<1x16x192xf32> to vector<16x192xf32>
    %214 = vector.extract_strided_slice %209 {offsets = [0, 0], sizes = [16, 32], strides = [1, 1]} : vector<16x192xf32> to vector<16x32xf32>
    %215 = vector.extract_strided_slice %206 {offsets = [0, 0], sizes = [16, 32], strides = [1, 1]} : vector<16x192xf32> to vector<16x32xf32>
    %216 = arith.addf %214, %215 : vector<16x32xf32>
    %217 = arith.negf %216 : vector<16x32xf32>
    %218 = math.exp %217 : vector<16x32xf32>
    %cst_55 = arith.constant 1.000000e+00 : f32
    %219 = vector.broadcast %cst_55 : f32 to vector<16x32xf32>
    %220 = arith.addf %219, %218 : vector<16x32xf32>
    %221 = arith.divf %219, %220 : vector<16x32xf32>
    %222 = vector.extract_strided_slice %209 {offsets = [0, 32], sizes = [16, 32], strides = [1, 1]} : vector<16x192xf32> to vector<16x32xf32>
    %223 = vector.extract_strided_slice %206 {offsets = [0, 32], sizes = [16, 32], strides = [1, 1]} : vector<16x192xf32> to vector<16x32xf32>
    %224 = arith.addf %222, %223 : vector<16x32xf32>
    %225 = arith.negf %224 : vector<16x32xf32>
    %226 = math.exp %225 : vector<16x32xf32>
    %cst_56 = arith.constant 1.000000e+00 : f32
    %227 = vector.broadcast %cst_56 : f32 to vector<16x32xf32>
    %228 = arith.addf %227, %226 : vector<16x32xf32>
    %229 = arith.divf %227, %228 : vector<16x32xf32>
    %230 = vector.extract_strided_slice %209 {offsets = [0, 64], sizes = [16, 32], strides = [1, 1]} : vector<16x192xf32> to vector<16x32xf32>
    %231 = vector.extract_strided_slice %206 {offsets = [0, 64], sizes = [16, 32], strides = [1, 1]} : vector<16x192xf32> to vector<16x32xf32>
    %232 = arith.mulf %221, %231 : vector<16x32xf32>
    %233 = arith.addf %230, %232 : vector<16x32xf32>
    %234 = math.tanh %233 : vector<16x32xf32>
    %cst_57 = arith.constant 1.000000e+00 : f32
    %235 = vector.broadcast %cst_57 : f32 to vector<16x32xf32>
    %236 = arith.subf %235, %229 : vector<16x32xf32>
    %237 = arith.mulf %236, %234 : vector<16x32xf32>
    %238 = arith.mulf %229, %176 : vector<16x32xf32>
    %239 = arith.addf %237, %238 : vector<16x32xf32>
    %240 = vector.extract_strided_slice %213 {offsets = [0, 96], sizes = [16, 32], strides = [1, 1]} : vector<16x192xf32> to vector<16x32xf32>
    %241 = vector.extract_strided_slice %206 {offsets = [0, 96], sizes = [16, 32], strides = [1, 1]} : vector<16x192xf32> to vector<16x32xf32>
    %242 = arith.addf %240, %241 : vector<16x32xf32>
    %243 = arith.negf %242 : vector<16x32xf32>
    %244 = math.exp %243 : vector<16x32xf32>
    %cst_58 = arith.constant 1.000000e+00 : f32
    %245 = vector.broadcast %cst_58 : f32 to vector<16x32xf32>
    %246 = arith.addf %245, %244 : vector<16x32xf32>
    %247 = arith.divf %245, %246 : vector<16x32xf32>
    %248 = vector.extract_strided_slice %213 {offsets = [0, 128], sizes = [16, 32], strides = [1, 1]} : vector<16x192xf32> to vector<16x32xf32>
    %249 = vector.extract_strided_slice %206 {offsets = [0, 128], sizes = [16, 32], strides = [1, 1]} : vector<16x192xf32> to vector<16x32xf32>
    %250 = arith.addf %248, %249 : vector<16x32xf32>
    %251 = arith.negf %250 : vector<16x32xf32>
    %252 = math.exp %251 : vector<16x32xf32>
    %cst_59 = arith.constant 1.000000e+00 : f32
    %253 = vector.broadcast %cst_59 : f32 to vector<16x32xf32>
    %254 = arith.addf %253, %252 : vector<16x32xf32>
    %255 = arith.divf %253, %254 : vector<16x32xf32>
    %256 = vector.extract_strided_slice %213 {offsets = [0, 160], sizes = [16, 32], strides = [1, 1]} : vector<16x192xf32> to vector<16x32xf32>
    %257 = vector.extract_strided_slice %206 {offsets = [0, 160], sizes = [16, 32], strides = [1, 1]} : vector<16x192xf32> to vector<16x32xf32>
    %258 = arith.mulf %247, %257 : vector<16x32xf32>
    %259 = arith.addf %256, %258 : vector<16x32xf32>
    %260 = math.tanh %259 : vector<16x32xf32>
    %cst_60 = arith.constant 1.000000e+00 : f32
    %261 = vector.broadcast %cst_60 : f32 to vector<16x32xf32>
    %262 = arith.subf %261, %255 : vector<16x32xf32>
    %263 = arith.mulf %262, %260 : vector<16x32xf32>
    %264 = arith.mulf %255, %202 : vector<16x32xf32>
    %265 = arith.addf %263, %264 : vector<16x32xf32>
    %c4_i32 = arith.constant 4 : i32
    %266 = tpu.concatenate %239, %265 in 1 : vector<16x32xf32>, vector<16x32xf32> -> vector<16x64xf32>
    %267 = arith.truncf %266 : vector<16x64xf32> to vector<16x64xbf16>
    %cst_61 = arith.constant dense<0.000000e+00> : vector<16x192xf32>
    %268 = tpu.matmul %267, %9, %cst_61 {dimension_numbers = #tpu.dot_dimension_numbers<[1], [0], [0], [1], [0, 0, 1, 1], [], []>} : vector<16x64xbf16>, vector<64x192xbf16>, vector<16x192xf32> -> vector<16x192xf32>
    %269 = arith.addf %268, %12 : vector<16x192xf32>
    %270 = arith.index_cast %c4_i32 : i32 to index
    %c0_62 = arith.constant 0 : index
    %c0_63 = arith.constant 0 : index
    %271 = vector.load %arg7[%270, %c0_62, %c0_63] : memref<8x16x192xf32, #tpu.memory_space<vmem>>, vector<1x16x192xf32>
    %272 = vector.shape_cast %271 : vector<1x16x192xf32> to vector<16x192xf32>
    %c7_i32_64 = arith.constant 7 : i32
    %273 = arith.subi %c7_i32_64, %c4_i32 : i32
    %274 = arith.index_cast %273 : i32 to index
    %c0_65 = arith.constant 0 : index
    %c0_66 = arith.constant 0 : index
    %275 = vector.load %arg7[%274, %c0_65, %c0_66] : memref<8x16x192xf32, #tpu.memory_space<vmem>>, vector<1x16x192xf32>
    %276 = vector.shape_cast %275 : vector<1x16x192xf32> to vector<16x192xf32>
    %277 = vector.extract_strided_slice %272 {offsets = [0, 0], sizes = [16, 32], strides = [1, 1]} : vector<16x192xf32> to vector<16x32xf32>
    %278 = vector.extract_strided_slice %269 {offsets = [0, 0], sizes = [16, 32], strides = [1, 1]} : vector<16x192xf32> to vector<16x32xf32>
    %279 = arith.addf %277, %278 : vector<16x32xf32>
    %280 = arith.negf %279 : vector<16x32xf32>
    %281 = math.exp %280 : vector<16x32xf32>
    %cst_67 = arith.constant 1.000000e+00 : f32
    %282 = vector.broadcast %cst_67 : f32 to vector<16x32xf32>
    %283 = arith.addf %282, %281 : vector<16x32xf32>
    %284 = arith.divf %282, %283 : vector<16x32xf32>
    %285 = vector.extract_strided_slice %272 {offsets = [0, 32], sizes = [16, 32], strides = [1, 1]} : vector<16x192xf32> to vector<16x32xf32>
    %286 = vector.extract_strided_slice %269 {offsets = [0, 32], sizes = [16, 32], strides = [1, 1]} : vector<16x192xf32> to vector<16x32xf32>
    %287 = arith.addf %285, %286 : vector<16x32xf32>
    %288 = arith.negf %287 : vector<16x32xf32>
    %289 = math.exp %288 : vector<16x32xf32>
    %cst_68 = arith.constant 1.000000e+00 : f32
    %290 = vector.broadcast %cst_68 : f32 to vector<16x32xf32>
    %291 = arith.addf %290, %289 : vector<16x32xf32>
    %292 = arith.divf %290, %291 : vector<16x32xf32>
    %293 = vector.extract_strided_slice %272 {offsets = [0, 64], sizes = [16, 32], strides = [1, 1]} : vector<16x192xf32> to vector<16x32xf32>
    %294 = vector.extract_strided_slice %269 {offsets = [0, 64], sizes = [16, 32], strides = [1, 1]} : vector<16x192xf32> to vector<16x32xf32>
    %295 = arith.mulf %284, %294 : vector<16x32xf32>
    %296 = arith.addf %293, %295 : vector<16x32xf32>
    %297 = math.tanh %296 : vector<16x32xf32>
    %cst_69 = arith.constant 1.000000e+00 : f32
    %298 = vector.broadcast %cst_69 : f32 to vector<16x32xf32>
    %299 = arith.subf %298, %292 : vector<16x32xf32>
    %300 = arith.mulf %299, %297 : vector<16x32xf32>
    %301 = arith.mulf %292, %239 : vector<16x32xf32>
    %302 = arith.addf %300, %301 : vector<16x32xf32>
    %303 = vector.extract_strided_slice %276 {offsets = [0, 96], sizes = [16, 32], strides = [1, 1]} : vector<16x192xf32> to vector<16x32xf32>
    %304 = vector.extract_strided_slice %269 {offsets = [0, 96], sizes = [16, 32], strides = [1, 1]} : vector<16x192xf32> to vector<16x32xf32>
    %305 = arith.addf %303, %304 : vector<16x32xf32>
    %306 = arith.negf %305 : vector<16x32xf32>
    %307 = math.exp %306 : vector<16x32xf32>
    %cst_70 = arith.constant 1.000000e+00 : f32
    %308 = vector.broadcast %cst_70 : f32 to vector<16x32xf32>
    %309 = arith.addf %308, %307 : vector<16x32xf32>
    %310 = arith.divf %308, %309 : vector<16x32xf32>
    %311 = vector.extract_strided_slice %276 {offsets = [0, 128], sizes = [16, 32], strides = [1, 1]} : vector<16x192xf32> to vector<16x32xf32>
    %312 = vector.extract_strided_slice %269 {offsets = [0, 128], sizes = [16, 32], strides = [1, 1]} : vector<16x192xf32> to vector<16x32xf32>
    %313 = arith.addf %311, %312 : vector<16x32xf32>
    %314 = arith.negf %313 : vector<16x32xf32>
    %315 = math.exp %314 : vector<16x32xf32>
    %cst_71 = arith.constant 1.000000e+00 : f32
    %316 = vector.broadcast %cst_71 : f32 to vector<16x32xf32>
    %317 = arith.addf %316, %315 : vector<16x32xf32>
    %318 = arith.divf %316, %317 : vector<16x32xf32>
    %319 = vector.extract_strided_slice %276 {offsets = [0, 160], sizes = [16, 32], strides = [1, 1]} : vector<16x192xf32> to vector<16x32xf32>
    %320 = vector.extract_strided_slice %269 {offsets = [0, 160], sizes = [16, 32], strides = [1, 1]} : vector<16x192xf32> to vector<16x32xf32>
    %321 = arith.mulf %310, %320 : vector<16x32xf32>
    %322 = arith.addf %319, %321 : vector<16x32xf32>
    %323 = math.tanh %322 : vector<16x32xf32>
    %cst_72 = arith.constant 1.000000e+00 : f32
    %324 = vector.broadcast %cst_72 : f32 to vector<16x32xf32>
    %325 = arith.subf %324, %318 : vector<16x32xf32>
    %326 = arith.mulf %325, %323 : vector<16x32xf32>
    %327 = arith.mulf %318, %265 : vector<16x32xf32>
    %328 = arith.addf %326, %327 : vector<16x32xf32>
    %c5_i32 = arith.constant 5 : i32
    %329 = tpu.concatenate %302, %328 in 1 : vector<16x32xf32>, vector<16x32xf32> -> vector<16x64xf32>
    %330 = arith.truncf %329 : vector<16x64xf32> to vector<16x64xbf16>
    %cst_73 = arith.constant dense<0.000000e+00> : vector<16x192xf32>
    %331 = tpu.matmul %330, %9, %cst_73 {dimension_numbers = #tpu.dot_dimension_numbers<[1], [0], [0], [1], [0, 0, 1, 1], [], []>} : vector<16x64xbf16>, vector<64x192xbf16>, vector<16x192xf32> -> vector<16x192xf32>
    %332 = arith.addf %331, %12 : vector<16x192xf32>
    %333 = arith.index_cast %c5_i32 : i32 to index
    %c0_74 = arith.constant 0 : index
    %c0_75 = arith.constant 0 : index
    %334 = vector.load %arg7[%333, %c0_74, %c0_75] : memref<8x16x192xf32, #tpu.memory_space<vmem>>, vector<1x16x192xf32>
    %335 = vector.shape_cast %334 : vector<1x16x192xf32> to vector<16x192xf32>
    %c7_i32_76 = arith.constant 7 : i32
    %336 = arith.subi %c7_i32_76, %c5_i32 : i32
    %337 = arith.index_cast %336 : i32 to index
    %c0_77 = arith.constant 0 : index
    %c0_78 = arith.constant 0 : index
    %338 = vector.load %arg7[%337, %c0_77, %c0_78] : memref<8x16x192xf32, #tpu.memory_space<vmem>>, vector<1x16x192xf32>
    %339 = vector.shape_cast %338 : vector<1x16x192xf32> to vector<16x192xf32>
    %340 = vector.extract_strided_slice %335 {offsets = [0, 0], sizes = [16, 32], strides = [1, 1]} : vector<16x192xf32> to vector<16x32xf32>
    %341 = vector.extract_strided_slice %332 {offsets = [0, 0], sizes = [16, 32], strides = [1, 1]} : vector<16x192xf32> to vector<16x32xf32>
    %342 = arith.addf %340, %341 : vector<16x32xf32>
    %343 = arith.negf %342 : vector<16x32xf32>
    %344 = math.exp %343 : vector<16x32xf32>
    %cst_79 = arith.constant 1.000000e+00 : f32
    %345 = vector.broadcast %cst_79 : f32 to vector<16x32xf32>
    %346 = arith.addf %345, %344 : vector<16x32xf32>
    %347 = arith.divf %345, %346 : vector<16x32xf32>
    %348 = vector.extract_strided_slice %335 {offsets = [0, 32], sizes = [16, 32], strides = [1, 1]} : vector<16x192xf32> to vector<16x32xf32>
    %349 = vector.extract_strided_slice %332 {offsets = [0, 32], sizes = [16, 32], strides = [1, 1]} : vector<16x192xf32> to vector<16x32xf32>
    %350 = arith.addf %348, %349 : vector<16x32xf32>
    %351 = arith.negf %350 : vector<16x32xf32>
    %352 = math.exp %351 : vector<16x32xf32>
    %cst_80 = arith.constant 1.000000e+00 : f32
    %353 = vector.broadcast %cst_80 : f32 to vector<16x32xf32>
    %354 = arith.addf %353, %352 : vector<16x32xf32>
    %355 = arith.divf %353, %354 : vector<16x32xf32>
    %356 = vector.extract_strided_slice %335 {offsets = [0, 64], sizes = [16, 32], strides = [1, 1]} : vector<16x192xf32> to vector<16x32xf32>
    %357 = vector.extract_strided_slice %332 {offsets = [0, 64], sizes = [16, 32], strides = [1, 1]} : vector<16x192xf32> to vector<16x32xf32>
    %358 = arith.mulf %347, %357 : vector<16x32xf32>
    %359 = arith.addf %356, %358 : vector<16x32xf32>
    %360 = math.tanh %359 : vector<16x32xf32>
    %cst_81 = arith.constant 1.000000e+00 : f32
    %361 = vector.broadcast %cst_81 : f32 to vector<16x32xf32>
    %362 = arith.subf %361, %355 : vector<16x32xf32>
    %363 = arith.mulf %362, %360 : vector<16x32xf32>
    %364 = arith.mulf %355, %302 : vector<16x32xf32>
    %365 = arith.addf %363, %364 : vector<16x32xf32>
    %366 = vector.extract_strided_slice %339 {offsets = [0, 96], sizes = [16, 32], strides = [1, 1]} : vector<16x192xf32> to vector<16x32xf32>
    %367 = vector.extract_strided_slice %332 {offsets = [0, 96], sizes = [16, 32], strides = [1, 1]} : vector<16x192xf32> to vector<16x32xf32>
    %368 = arith.addf %366, %367 : vector<16x32xf32>
    %369 = arith.negf %368 : vector<16x32xf32>
    %370 = math.exp %369 : vector<16x32xf32>
    %cst_82 = arith.constant 1.000000e+00 : f32
    %371 = vector.broadcast %cst_82 : f32 to vector<16x32xf32>
    %372 = arith.addf %371, %370 : vector<16x32xf32>
    %373 = arith.divf %371, %372 : vector<16x32xf32>
    %374 = vector.extract_strided_slice %339 {offsets = [0, 128], sizes = [16, 32], strides = [1, 1]} : vector<16x192xf32> to vector<16x32xf32>
    %375 = vector.extract_strided_slice %332 {offsets = [0, 128], sizes = [16, 32], strides = [1, 1]} : vector<16x192xf32> to vector<16x32xf32>
    %376 = arith.addf %374, %375 : vector<16x32xf32>
    %377 = arith.negf %376 : vector<16x32xf32>
    %378 = math.exp %377 : vector<16x32xf32>
    %cst_83 = arith.constant 1.000000e+00 : f32
    %379 = vector.broadcast %cst_83 : f32 to vector<16x32xf32>
    %380 = arith.addf %379, %378 : vector<16x32xf32>
    %381 = arith.divf %379, %380 : vector<16x32xf32>
    %382 = vector.extract_strided_slice %339 {offsets = [0, 160], sizes = [16, 32], strides = [1, 1]} : vector<16x192xf32> to vector<16x32xf32>
    %383 = vector.extract_strided_slice %332 {offsets = [0, 160], sizes = [16, 32], strides = [1, 1]} : vector<16x192xf32> to vector<16x32xf32>
    %384 = arith.mulf %373, %383 : vector<16x32xf32>
    %385 = arith.addf %382, %384 : vector<16x32xf32>
    %386 = math.tanh %385 : vector<16x32xf32>
    %cst_84 = arith.constant 1.000000e+00 : f32
    %387 = vector.broadcast %cst_84 : f32 to vector<16x32xf32>
    %388 = arith.subf %387, %381 : vector<16x32xf32>
    %389 = arith.mulf %388, %386 : vector<16x32xf32>
    %390 = arith.mulf %381, %328 : vector<16x32xf32>
    %391 = arith.addf %389, %390 : vector<16x32xf32>
    %c6_i32 = arith.constant 6 : i32
    %392 = tpu.concatenate %365, %391 in 1 : vector<16x32xf32>, vector<16x32xf32> -> vector<16x64xf32>
    %393 = arith.truncf %392 : vector<16x64xf32> to vector<16x64xbf16>
    %cst_85 = arith.constant dense<0.000000e+00> : vector<16x192xf32>
    %394 = tpu.matmul %393, %9, %cst_85 {dimension_numbers = #tpu.dot_dimension_numbers<[1], [0], [0], [1], [0, 0, 1, 1], [], []>} : vector<16x64xbf16>, vector<64x192xbf16>, vector<16x192xf32> -> vector<16x192xf32>
    %395 = arith.addf %394, %12 : vector<16x192xf32>
    %396 = arith.index_cast %c6_i32 : i32 to index
    %c0_86 = arith.constant 0 : index
    %c0_87 = arith.constant 0 : index
    %397 = vector.load %arg7[%396, %c0_86, %c0_87] : memref<8x16x192xf32, #tpu.memory_space<vmem>>, vector<1x16x192xf32>
    %398 = vector.shape_cast %397 : vector<1x16x192xf32> to vector<16x192xf32>
    %c7_i32_88 = arith.constant 7 : i32
    %399 = arith.subi %c7_i32_88, %c6_i32 : i32
    %400 = arith.index_cast %399 : i32 to index
    %c0_89 = arith.constant 0 : index
    %c0_90 = arith.constant 0 : index
    %401 = vector.load %arg7[%400, %c0_89, %c0_90] : memref<8x16x192xf32, #tpu.memory_space<vmem>>, vector<1x16x192xf32>
    %402 = vector.shape_cast %401 : vector<1x16x192xf32> to vector<16x192xf32>
    %403 = vector.extract_strided_slice %398 {offsets = [0, 0], sizes = [16, 32], strides = [1, 1]} : vector<16x192xf32> to vector<16x32xf32>
    %404 = vector.extract_strided_slice %395 {offsets = [0, 0], sizes = [16, 32], strides = [1, 1]} : vector<16x192xf32> to vector<16x32xf32>
    %405 = arith.addf %403, %404 : vector<16x32xf32>
    %406 = arith.negf %405 : vector<16x32xf32>
    %407 = math.exp %406 : vector<16x32xf32>
    %cst_91 = arith.constant 1.000000e+00 : f32
    %408 = vector.broadcast %cst_91 : f32 to vector<16x32xf32>
    %409 = arith.addf %408, %407 : vector<16x32xf32>
    %410 = arith.divf %408, %409 : vector<16x32xf32>
    %411 = vector.extract_strided_slice %398 {offsets = [0, 32], sizes = [16, 32], strides = [1, 1]} : vector<16x192xf32> to vector<16x32xf32>
    %412 = vector.extract_strided_slice %395 {offsets = [0, 32], sizes = [16, 32], strides = [1, 1]} : vector<16x192xf32> to vector<16x32xf32>
    %413 = arith.addf %411, %412 : vector<16x32xf32>
    %414 = arith.negf %413 : vector<16x32xf32>
    %415 = math.exp %414 : vector<16x32xf32>
    %cst_92 = arith.constant 1.000000e+00 : f32
    %416 = vector.broadcast %cst_92 : f32 to vector<16x32xf32>
    %417 = arith.addf %416, %415 : vector<16x32xf32>
    %418 = arith.divf %416, %417 : vector<16x32xf32>
    %419 = vector.extract_strided_slice %398 {offsets = [0, 64], sizes = [16, 32], strides = [1, 1]} : vector<16x192xf32> to vector<16x32xf32>
    %420 = vector.extract_strided_slice %395 {offsets = [0, 64], sizes = [16, 32], strides = [1, 1]} : vector<16x192xf32> to vector<16x32xf32>
    %421 = arith.mulf %410, %420 : vector<16x32xf32>
    %422 = arith.addf %419, %421 : vector<16x32xf32>
    %423 = math.tanh %422 : vector<16x32xf32>
    %cst_93 = arith.constant 1.000000e+00 : f32
    %424 = vector.broadcast %cst_93 : f32 to vector<16x32xf32>
    %425 = arith.subf %424, %418 : vector<16x32xf32>
    %426 = arith.mulf %425, %423 : vector<16x32xf32>
    %427 = arith.mulf %418, %365 : vector<16x32xf32>
    %428 = arith.addf %426, %427 : vector<16x32xf32>
    %429 = vector.extract_strided_slice %402 {offsets = [0, 96], sizes = [16, 32], strides = [1, 1]} : vector<16x192xf32> to vector<16x32xf32>
    %430 = vector.extract_strided_slice %395 {offsets = [0, 96], sizes = [16, 32], strides = [1, 1]} : vector<16x192xf32> to vector<16x32xf32>
    %431 = arith.addf %429, %430 : vector<16x32xf32>
    %432 = arith.negf %431 : vector<16x32xf32>
    %433 = math.exp %432 : vector<16x32xf32>
    %cst_94 = arith.constant 1.000000e+00 : f32
    %434 = vector.broadcast %cst_94 : f32 to vector<16x32xf32>
    %435 = arith.addf %434, %433 : vector<16x32xf32>
    %436 = arith.divf %434, %435 : vector<16x32xf32>
    %437 = vector.extract_strided_slice %402 {offsets = [0, 128], sizes = [16, 32], strides = [1, 1]} : vector<16x192xf32> to vector<16x32xf32>
    %438 = vector.extract_strided_slice %395 {offsets = [0, 128], sizes = [16, 32], strides = [1, 1]} : vector<16x192xf32> to vector<16x32xf32>
    %439 = arith.addf %437, %438 : vector<16x32xf32>
    %440 = arith.negf %439 : vector<16x32xf32>
    %441 = math.exp %440 : vector<16x32xf32>
    %cst_95 = arith.constant 1.000000e+00 : f32
    %442 = vector.broadcast %cst_95 : f32 to vector<16x32xf32>
    %443 = arith.addf %442, %441 : vector<16x32xf32>
    %444 = arith.divf %442, %443 : vector<16x32xf32>
    %445 = vector.extract_strided_slice %402 {offsets = [0, 160], sizes = [16, 32], strides = [1, 1]} : vector<16x192xf32> to vector<16x32xf32>
    %446 = vector.extract_strided_slice %395 {offsets = [0, 160], sizes = [16, 32], strides = [1, 1]} : vector<16x192xf32> to vector<16x32xf32>
    %447 = arith.mulf %436, %446 : vector<16x32xf32>
    %448 = arith.addf %445, %447 : vector<16x32xf32>
    %449 = math.tanh %448 : vector<16x32xf32>
    %cst_96 = arith.constant 1.000000e+00 : f32
    %450 = vector.broadcast %cst_96 : f32 to vector<16x32xf32>
    %451 = arith.subf %450, %444 : vector<16x32xf32>
    %452 = arith.mulf %451, %449 : vector<16x32xf32>
    %453 = arith.mulf %444, %391 : vector<16x32xf32>
    %454 = arith.addf %452, %453 : vector<16x32xf32>
    %c7_i32_97 = arith.constant 7 : i32
    %455 = tpu.concatenate %428, %454 in 1 : vector<16x32xf32>, vector<16x32xf32> -> vector<16x64xf32>
    %456 = arith.truncf %455 : vector<16x64xf32> to vector<16x64xbf16>
    %cst_98 = arith.constant dense<0.000000e+00> : vector<16x192xf32>
    %457 = tpu.matmul %456, %9, %cst_98 {dimension_numbers = #tpu.dot_dimension_numbers<[1], [0], [0], [1], [0, 0, 1, 1], [], []>} : vector<16x64xbf16>, vector<64x192xbf16>, vector<16x192xf32> -> vector<16x192xf32>
    %458 = arith.addf %457, %12 : vector<16x192xf32>
    %459 = arith.index_cast %c7_i32_97 : i32 to index
    %c0_99 = arith.constant 0 : index
    %c0_100 = arith.constant 0 : index
    %460 = vector.load %arg7[%459, %c0_99, %c0_100] : memref<8x16x192xf32, #tpu.memory_space<vmem>>, vector<1x16x192xf32>
    %461 = vector.shape_cast %460 : vector<1x16x192xf32> to vector<16x192xf32>
    %c7_i32_101 = arith.constant 7 : i32
    %462 = arith.subi %c7_i32_101, %c7_i32_97 : i32
    %463 = arith.index_cast %462 : i32 to index
    %c0_102 = arith.constant 0 : index
    %c0_103 = arith.constant 0 : index
    %464 = vector.load %arg7[%463, %c0_102, %c0_103] : memref<8x16x192xf32, #tpu.memory_space<vmem>>, vector<1x16x192xf32>
    %465 = vector.shape_cast %464 : vector<1x16x192xf32> to vector<16x192xf32>
    %466 = vector.extract_strided_slice %461 {offsets = [0, 0], sizes = [16, 32], strides = [1, 1]} : vector<16x192xf32> to vector<16x32xf32>
    %467 = vector.extract_strided_slice %458 {offsets = [0, 0], sizes = [16, 32], strides = [1, 1]} : vector<16x192xf32> to vector<16x32xf32>
    %468 = arith.addf %466, %467 : vector<16x32xf32>
    %469 = arith.negf %468 : vector<16x32xf32>
    %470 = math.exp %469 : vector<16x32xf32>
    %cst_104 = arith.constant 1.000000e+00 : f32
    %471 = vector.broadcast %cst_104 : f32 to vector<16x32xf32>
    %472 = arith.addf %471, %470 : vector<16x32xf32>
    %473 = arith.divf %471, %472 : vector<16x32xf32>
    %474 = vector.extract_strided_slice %461 {offsets = [0, 32], sizes = [16, 32], strides = [1, 1]} : vector<16x192xf32> to vector<16x32xf32>
    %475 = vector.extract_strided_slice %458 {offsets = [0, 32], sizes = [16, 32], strides = [1, 1]} : vector<16x192xf32> to vector<16x32xf32>
    %476 = arith.addf %474, %475 : vector<16x32xf32>
    %477 = arith.negf %476 : vector<16x32xf32>
    %478 = math.exp %477 : vector<16x32xf32>
    %cst_105 = arith.constant 1.000000e+00 : f32
    %479 = vector.broadcast %cst_105 : f32 to vector<16x32xf32>
    %480 = arith.addf %479, %478 : vector<16x32xf32>
    %481 = arith.divf %479, %480 : vector<16x32xf32>
    %482 = vector.extract_strided_slice %461 {offsets = [0, 64], sizes = [16, 32], strides = [1, 1]} : vector<16x192xf32> to vector<16x32xf32>
    %483 = vector.extract_strided_slice %458 {offsets = [0, 64], sizes = [16, 32], strides = [1, 1]} : vector<16x192xf32> to vector<16x32xf32>
    %484 = arith.mulf %473, %483 : vector<16x32xf32>
    %485 = arith.addf %482, %484 : vector<16x32xf32>
    %486 = math.tanh %485 : vector<16x32xf32>
    %cst_106 = arith.constant 1.000000e+00 : f32
    %487 = vector.broadcast %cst_106 : f32 to vector<16x32xf32>
    %488 = arith.subf %487, %481 : vector<16x32xf32>
    %489 = arith.mulf %488, %486 : vector<16x32xf32>
    %490 = arith.mulf %481, %428 : vector<16x32xf32>
    %491 = arith.addf %489, %490 : vector<16x32xf32>
    %492 = vector.extract_strided_slice %465 {offsets = [0, 96], sizes = [16, 32], strides = [1, 1]} : vector<16x192xf32> to vector<16x32xf32>
    %493 = vector.extract_strided_slice %458 {offsets = [0, 96], sizes = [16, 32], strides = [1, 1]} : vector<16x192xf32> to vector<16x32xf32>
    %494 = arith.addf %492, %493 : vector<16x32xf32>
    %495 = arith.negf %494 : vector<16x32xf32>
    %496 = math.exp %495 : vector<16x32xf32>
    %cst_107 = arith.constant 1.000000e+00 : f32
    %497 = vector.broadcast %cst_107 : f32 to vector<16x32xf32>
    %498 = arith.addf %497, %496 : vector<16x32xf32>
    %499 = arith.divf %497, %498 : vector<16x32xf32>
    %500 = vector.extract_strided_slice %465 {offsets = [0, 128], sizes = [16, 32], strides = [1, 1]} : vector<16x192xf32> to vector<16x32xf32>
    %501 = vector.extract_strided_slice %458 {offsets = [0, 128], sizes = [16, 32], strides = [1, 1]} : vector<16x192xf32> to vector<16x32xf32>
    %502 = arith.addf %500, %501 : vector<16x32xf32>
    %503 = arith.negf %502 : vector<16x32xf32>
    %504 = math.exp %503 : vector<16x32xf32>
    %cst_108 = arith.constant 1.000000e+00 : f32
    %505 = vector.broadcast %cst_108 : f32 to vector<16x32xf32>
    %506 = arith.addf %505, %504 : vector<16x32xf32>
    %507 = arith.divf %505, %506 : vector<16x32xf32>
    %508 = vector.extract_strided_slice %465 {offsets = [0, 160], sizes = [16, 32], strides = [1, 1]} : vector<16x192xf32> to vector<16x32xf32>
    %509 = vector.extract_strided_slice %458 {offsets = [0, 160], sizes = [16, 32], strides = [1, 1]} : vector<16x192xf32> to vector<16x32xf32>
    %510 = arith.mulf %499, %509 : vector<16x32xf32>
    %511 = arith.addf %508, %510 : vector<16x32xf32>
    %512 = math.tanh %511 : vector<16x32xf32>
    %cst_109 = arith.constant 1.000000e+00 : f32
    %513 = vector.broadcast %cst_109 : f32 to vector<16x32xf32>
    %514 = arith.subf %513, %507 : vector<16x32xf32>
    %515 = arith.mulf %514, %512 : vector<16x32xf32>
    %516 = arith.mulf %507, %454 : vector<16x32xf32>
    %517 = arith.addf %515, %516 : vector<16x32xf32>
    %c8_i32 = arith.constant 8 : i32
    %518 = arith.maximumf %491, %517 : vector<16x32xf32>
    %c0_110 = arith.constant 0 : index
    %c0_111 = arith.constant 0 : index
    %519 = vector.load %arg6[%c0_110, %c0_111] : memref<16x32xf32, #tpu.memory_space<vmem>>, vector<16x32xf32>
    tpu.vector_store %arg6[%c0_110, %c0_111], %518 {strides = array<i32>} : memref<16x32xf32, #tpu.memory_space<vmem>>, vector<16x32xf32>,
    return
  }
  func.func @transform_0(%arg0: i32) -> (i32, i32, i32) {
    %c0_i32 = arith.constant 0 : i32
    %c0_i32_0 = arith.constant 0 : i32
    %c0_i32_1 = arith.constant 0 : i32
    return %c0_i32, %arg0, %c0_i32_0 : i32, i32, i32
  }
  func.func @transform_1(%arg0: i32) -> (i32, i32) {
    %c0_i32 = arith.constant 0 : i32
    %c0_i32_0 = arith.constant 0 : i32
    %c0_i32_1 = arith.constant 0 : i32
    return %c0_i32, %c0_i32_0 : i32, i32
  }
  func.func @transform_2(%arg0: i32) -> (i32, i32) {
    %c0_i32 = arith.constant 0 : i32
    %c0_i32_0 = arith.constant 0 : i32
    %c0_i32_1 = arith.constant 0 : i32
    return %c0_i32, %c0_i32_0 : i32, i32
  }
  func.func @transform_3(%arg0: i32) -> (i32, i32) {
    %c0_i32 = arith.constant 0 : i32
    %c0_i32_0 = arith.constant 0 : i32
    %c0_i32_1 = arith.constant 0 : i32
    return %c0_i32, %c0_i32_0 : i32, i32
  }
  func.func @transform_4(%arg0: i32) -> (i32, i32) {
    %c0_i32 = arith.constant 0 : i32
    %c0_i32_0 = arith.constant 0 : i32
    %c0_i32_1 = arith.constant 0 : i32
    return %c0_i32, %c0_i32_0 : i32, i32
  }
  func.func @transform_5(%arg0: i32) -> (i32, i32) {
    %c0_i32 = arith.constant 0 : i32
    %c0_i32_0 = arith.constant 0 : i32
    return %arg0, %c0_i32 : i32, i32
  }
}

</mosaic_0001>

<bundles_post_ra>
// kernel: base_encoder_forward.1
= control target key start
LH: loop header
LB: loop body
LE: loop exit
PB: predicated region body
PF: predicated region fallthrough
CT: control target
= control target key end

     0   :  { %v2317_v1 = vmov 0   ;;  %vm113_vm0 = vcmask 261120   ;;  %v2318_v15 = vmov 0.0|0.0   ;;  %v43_v22 = vlaneseq  ;;  %s2321_s10 = smov 32   ;;  %s3045_s1 = inlined_call_operand.vmem [shape: bf16[32,192], index: 1, kind: input, shape index: {}]   ;;  %s3046_s2 = inlined_call_operand.vmem [shape: bf16[64,192], index: 2, kind: input, shape index: {}]   ;;  %s3047_s0 = inlined_call_operand.vmem [shape: bf16[8,16,32], index: 0, kind: input, shape index: {}]   ;;  %s3048_s3 = inlined_call_operand.vmem [shape: f32[1,192], index: 3, kind: input, shape index: {}]   ;;  %s3049_s4 = inlined_call_operand.vmem [shape: f32[1,192], index: 4, kind: input, shape index: {}]   ;;  %s3050_s5 = inlined_call_operand.vmem [shape: f32[16,32], index: 5, kind: output, shape index: {}]  }
   0x1   :  { %v2011_v0 = vld [vmem:[%s3045_s1 + $0x4] ss:$8 sps:$4 sm:$0xff]   ;;  %170 = vmatprep.mubr.bf16.mxu0 %v2317_v1  ;;  %380 = vmatprep.mubr.bf16.mxu1 %v2317_v1  ;;  %v2015_v3 = vld [vmem:[%s3045_s1] ss:$8 sps:$4 sm:$0xff]   ;;  %v2017_v5 = vld [vmem:[%s3045_s1 + $0x14] ss:$8 sps:$4 sm:$0xff]  }
   0x2   :  { %v2360_v2 = vld [vmem:[%s3046_s2 + $0x4] ss:$8 sps:$4 sm:$0xff]   ;;  %138 = vmatprep.subr.bf16.mxu0 %v2011_v0  ;;  %v2368_v4 = vld [vmem:[%s3046_s2] ss:$8 sps:$4 sm:$0xff]   ;;  %v2378_v6 = vld [vmem:[%s3046_s2 + $0x14] ss:$8 sps:$4 sm:$0xff]  }
   0x3   :  { %348 = vmatprep.subr.bf16.mxu1 %v2360_v2  ;;  %139 = vmatpush1.bf16.msra.mxu0 %v2015_v3  ;;  %v2021_v7 = vld [vmem:[%s3045_s1 + $0x10] ss:$8 sps:$4 sm:$0xff]   ;;  %v2023_v9 = vld [vmem:[%s3047_s0] sm:$0xff]   ;;  %v2407_v12 = vld [vmem:[%s3046_s2 + $0x34] ss:$8 sps:$4 sm:$0xff]   ;;  %v44_v23 = vshrl.u32 %v43_v22, 7 }
   0x4   :  { %349 = vmatpush1.bf16.msra.mxu1 %v2368_v4  ;;  %140 = vmatprep.subr.bf16.mxu0 %v2017_v5  ;;  %v2386_v8 = vld [vmem:[%s3046_s2 + $0x10] ss:$8 sps:$4 sm:$0xff]   ;;  %v2395_v10 = vld [vmem:[%s3046_s2 + $0x24] ss:$8 sps:$4 sm:$0xff]   ;;  %v2401_v11 = vld [vmem:[%s3046_s2 + $0x20] ss:$8 sps:$4 sm:$0xff]  }
   0x5   :  { %350 = vmatprep.subr.bf16.mxu1 %v2378_v6  ;;  %v2415_v13 = vld [vmem:[%s3046_s2 + $0x30] ss:$8 sps:$4 sm:$0xff]   ;;  %v2030_v14 = vld [vmem:[%s3047_s0 + $0x8] sm:$0xff]   ;;  %v2033_v18 = vld [vmem:[%s3047_s0 + $0x20] sm:$0xff]   ;;  %v45_v24 = vsub.s32 0, %v44_v23  ;;  %v49_v26 = vsub.s32 1, %v44_v23 }
   0x6   :  { %v2031_v16 = vld [vmem:[%s3047_s0 + $0x10] sm:$0xff]   ;;  %v2032_v17 = vld [vmem:[%s3047_s0 + $0x18] sm:$0xff]   ;;  %v2034_v19 = vld [vmem:[%s3047_s0 + $0x28] sm:$0xff]   ;;  %vm252_vm1 = vcmask 523264  }
   0x7   :  { %141 = vmatpush1.bf16.msra.mxu0 %v2021_v7  ;;  %v2035_v20 = vld [vmem:[%s3047_s0 + $0x30] sm:$0xff]   ;;  %v2036_v21 = vld [vmem:[%s3047_s0 + $0x38] sm:$0xff]   ;;  %v41_v25 = vld [vmem:[%s3048_s3] sm:$0x3]  ;;  %s2319_s3 = smov 64  }
   0x8   :  { %351 = vmatpush1.bf16.msra.mxu1 %v2386_v8  ;;  %1119 = vmatprep.subr.bf16.mxu0 %v2360_v2  ;;  %v2476_v27 = vrot.slane %v41_v25, %v45_v24  ;;  %v2478_v28 = vrot.slane %v41_v25, %v49_v26  ;;  %v292_v34 = vld [vmem:[%s3049_s4] sm:$0x3]  ;;  %s2320_s4 = smov 96  }
   0x9   :  { %352 = vmatprep.subr.bf16.mxu1 %v2395_v10  ;;  %v2494_v38 = vrot.slane %v292_v34, %v45_v24  ;;  %v2496_v39 = vrot.slane %v292_v34, %v49_v26 }
   0xa   :  { %1865 = vmatmul.mubr.msk.bf16.vlgmr.msra.gmra.mrb[0].mxu0 %vm113_vm0, %v2023_v9 }
   0xb   :  { %180 = vmatprep.mubr.bf16.mxu0 %v2317_v1  ;;  %1120 = vmatpush1.bf16.msra.mxu0 %v2368_v4 }
   0xc   :  { %353 = vmatpush1.bf16.msra.mxu1 %v2401_v11  ;;  %1121 = vmatprep.subr.bf16.mxu0 %v2378_v6 }
   0xd   :  { %354 = vmatprep.subr.bf16.mxu1 %v2407_v12 }
   0xf   :  { %1122 = vmatpush1.bf16.msra.mxu0 %v2386_v8 }
  0x10   :  { %355 = vmatpush1.bf16.msra.mxu1 %v2415_v13  ;;  %1123 = vmatprep.subr.bf16.mxu0 %v2395_v10 }
  0x11   :  { %540 = vmatprep.subr.bf16.mxu1 %v2360_v2 }
  0x12   :  { %1866 = vmatmul.mubr.msk.bf16.gmra.mrb[4].mxu0 %vm113_vm0, %v2030_v14 }
  0x13   :  { %381 = vmatmul.mubr.bf16.vlgmr.msra.gmra.mrb[0].mxu1 %v2318_v15  ;;  %190 = vmatprep.mubr.bf16.mxu0 %v2317_v1 }
  0x14   :  { %541 = vmatpush1.bf16.msra.mxu1 %v2368_v4  ;;  %572 = vmatprep.mubr.bf16.mxu1 %v2317_v1 }
  0x15   :  { %542 = vmatprep.subr.bf16.mxu1 %v2378_v6  ;;  %1124 = vmatpush1.bf16.msra.mxu0 %v2401_v11 }
  0x16   :  { %1125 = vmatprep.subr.bf16.mxu0 %v2407_v12 }
  0x18   :  { %543 = vmatpush1.bf16.msra.mxu1 %v2386_v8 }
  0x19   :  { %544 = vmatprep.subr.bf16.mxu1 %v2395_v10  ;;  %1126 = vmatpush1.bf16.msra.mxu0 %v2415_v13 }
  0x1a   :  { %1867 = vmatmul.mubr.msk.bf16.gmra.mrb[8].mxu0 %vm113_vm0, %v2031_v16  ;;  %1485 = vmatprep.subr.bf16.mxu0 %v2360_v2 }
  0x1b   :  { %200 = vmatprep.mubr.bf16.mxu0 %v2317_v1 }
  0x1c   :  { %545 = vmatpush1.bf16.msra.mxu1 %v2401_v11 }
  0x1d   :  { %546 = vmatprep.subr.bf16.mxu1 %v2407_v12 }
  0x20   :  { %547 = vmatpush1.bf16.msra.mxu1 %v2415_v13 }
  0x21   :  { %733 = vmatprep.subr.bf16.mxu1 %v2360_v2 }
  0x22   :  { %1868 = vmatmul.mubr.msk.bf16.gmra.mrb[12].mxu0 %vm113_vm0, %v2032_v17 }
  0x23   :  { %210 = vmatprep.mubr.bf16.mxu0 %v2317_v1 }
  0x2a   :  { %1869 = vmatmul.mubr.msk.bf16.gmra.mrb[16].mxu0 %vm113_vm0, %v2033_v18 }
  0x2b   :  { %220 = vmatprep.mubr.bf16.mxu0 %v2317_v1 }
  0x32   :  { %1870 = vmatmul.mubr.msk.bf16.gmra.mrb[20].mxu0 %vm113_vm0, %v2034_v19 }
  0x33   :  { %230 = vmatprep.mubr.bf16.mxu0 %v2317_v1 }
  0x3a   :  { %1871 = vmatmul.mubr.msk.bf16.gmra.mrb[24].mxu0 %vm113_vm0, %v2035_v20 }
  0x3b   :  { %240 = vmatprep.mubr.bf16.mxu0 %v2317_v1 }
  0x42   :  { %1872 = vmatmul.mubr.msk.bf16.gmra.mrb[28].mxu0 %vm113_vm0, %v2036_v21 }
  0x43   :  { %1151 = vmatprep.mubr.bf16.mxu0 %v2317_v1 }
  0xdd   :  { %v172_v29 = vpop.f32.mrb[0].mxu0 }
  0xde   :  { %v2481_v30 = vadd.f32 %v172_v29, %v2476_v27  ;;  %v174_v31 = vpop.f32.mrb[1].mxu0 }
  0xdf   :  { %v175_v32 = vadd.f32 %v174_v31, %v2478_v28  ;;  %v176_v33 = vpop.f32.mrb[2].mxu0 }
  0xe0   :  { %251 = vst [vmem:[#allocation2] sm:$0xff] %v2481_v30  ;;  %v2489_v35 = vadd.f32 %v176_v33, %v2476_v27  ;;  %v178_v36 = vpop.f32.mrb[3].mxu0 }
  0xe1   :  { %253 = vst.msk [vmem:[#allocation2 + $0x8] sm:$0xff] %vm252_vm1, %v175_v32  ;;  %v179_v37 = vadd.f32 %v178_v36, %v2478_v28 }
  0xe2   :  { %254 = vst [vmem:[#allocation2 + $0x10] sm:$0xff] %v2489_v35 }
  0xe3   :  { %255 = vst.msk [vmem:[#allocation2 + $0x18] sm:$0xff] %vm252_vm1, %v179_v37 }
  0xe5   :  { %v182_v41 = vpop.f32.mrb[4].mxu0 }
  0xe6   :  { %v382_v40 = vpop.f32.mrb[0].mxu1  ;;  %v2503_v44 = vadd.f32 %v182_v41, %v2476_v27  ;;  %v184_v45 = vpop.f32.mrb[5].mxu0 }
  0xe7   :  { %v2500_v42 = vadd.f32 %v382_v40, %v2494_v38  ;;  %v384_v43 = vpop.f32.mrb[1].mxu1  ;;  %v185_v48 = vadd.f32 %v184_v45, %v2478_v28  ;;  %v186_v49 = vpop.f32.mrb[6].mxu0 }
  0xe8   :  { %v2506_v46 = vadd.f32 %v384_v43, %v2496_v39  ;;  %v386_v47 = vpop.f32.mrb[2].mxu1  ;;  %256 = vst [vmem:[#allocation2 + $0x20] sm:$0xff] %v2503_v44  ;;  %v2513_v51 = vadd.f32 %v186_v49, %v2476_v27  ;;  %v188_v52 = vpop.f32.mrb[7].mxu0 }
  0xe9   :  { %v388_v50 = vpop.f32.mrb[3].mxu1  ;;  %416 = vrot.lane.b32.xlu0 %v2500_v42, %s2319_s3  ;;  %257 = vst.msk [vmem:[#allocation2 + $0x28] sm:$0xff] %vm252_vm1, %v185_v48  ;;  %v189_v53 = vadd.f32 %v188_v52, %v2478_v28  ;;  %v2520_v54 = vadd.f32 %v386_v47, %v2494_v38 }
  0xea   :  { %482 = vrot.lane.b32.xlu1 %v2506_v46, %s2319_s3  ;;  %258 = vst [vmem:[#allocation2 + $0x30] sm:$0xff] %v2513_v51  ;;  %v2524_v55 = vadd.f32 %v388_v50, %v2496_v39 }
  0xeb   :  { %259 = vst.msk [vmem:[#allocation2 + $0x38] sm:$0xff] %vm252_vm1, %v189_v53 }
  0xed   :  { %418 = vrot.lane.b32.xlu0 %v2520_v54, %s2319_s3  ;;  %v192_v56 = vpop.f32.mrb[8].mxu0 }
  0xee   :  { %484 = vrot.lane.b32.xlu1 %v2524_v55, %s2319_s3  ;;  %v2532_v57 = vadd.f32 %v192_v56, %v2476_v27  ;;  %v194_v58 = vpop.f32.mrb[9].mxu0 }
  0xef   :  { %v195_v59 = vadd.f32 %v194_v58, %v2478_v28  ;;  %v196_v60 = vpop.f32.mrb[10].mxu0 }
  0xf0   :  { %260 = vst [vmem:[#allocation2 + $0x40] sm:$0xff] %v2532_v57  ;;  %v2537_v61 = vadd.f32 %v196_v60, %v2476_v27  ;;  %v198_v62 = vpop.f32.mrb[11].mxu0 }
  0xf1   :  { %261 = vst.msk [vmem:[#allocation2 + $0x48] sm:$0xff] %vm252_vm1, %v195_v59  ;;  %v199_v63 = vadd.f32 %v198_v62, %v2478_v28 }
  0xf2   :  { %262 = vst [vmem:[#allocation2 + $0x50] sm:$0xff] %v2537_v61 }
  0xf3   :  { %263 = vst.msk [vmem:[#allocation2 + $0x58] sm:$0xff] %vm252_vm1, %v199_v63  ;;  %v400_v63 = vadd.f32 %v2500_v42, %v2481_v30 }
  0xf5   :  { %v202_v0 = vpop.f32.mrb[12].mxu0 }
  0xf6   :  { %v2544_v3 = vadd.f32 %v202_v0, %v2476_v27  ;;  %v204_v5 = vpop.f32.mrb[13].mxu0  ;;  %v401_v0 = vadd.f32 %v2520_v54, %v2489_v35 }
  0xf7   :  { %v205_v7 = vadd.f32 %v204_v5, %v2478_v28  ;;  %v206_v9 = vpop.f32.mrb[14].mxu0  ;;  %v1881_v5 = vmul.f32 -1.442695, %v400_v63 }
  0xf8   :  { %264 = vst [vmem:[#allocation2 + $0x60] sm:$0xff] %v2544_v3  ;;  %v2549_v14 = vadd.f32 %v206_v9, %v2476_v27  ;;  %v208_v15 = vpop.f32.mrb[15].mxu0  ;;  %v1882_v9 = vmul.f32 -1.442695, %v401_v0 }
  0xf9   :  { %265 = vst.msk [vmem:[#allocation2 + $0x68] sm:$0xff] %vm252_vm1, %v205_v7  ;;  %v209_v16 = vadd.f32 %v208_v15, %v2478_v28  ;;  %2037 = vpow2.f32 %v1881_v5 }
  0xfa   :  { %266 = vst [vmem:[#allocation2 + $0x70] sm:$0xff] %v2549_v14  ;;  %2039 = vpow2.f32 %v1882_v9 }
  0xfb   :  { %267 = vst.msk [vmem:[#allocation2 + $0x78] sm:$0xff] %vm252_vm1, %v209_v16 }
  0xfd   :  { %v212_v17 = vpop.f32.mrb[16].mxu0 }
  0xfe   :  { %v2556_v18 = vadd.f32 %v212_v17, %v2476_v27  ;;  %v214_v19 = vpop.f32.mrb[17].mxu0 }
  0xff   :  { %v215_v20 = vadd.f32 %v214_v19, %v2478_v28  ;;  %v216_v21 = vpop.f32.mrb[18].mxu0 }
 0x100   :  { %268 = vst [vmem:[#allocation2 + $0x80] sm:$0xff] %v2556_v18  ;;  %v2561_v22 = vadd.f32 %v216_v21, %v2476_v27  ;;  %v218_v23 = vpop.f32.mrb[19].mxu0 }
 0x101   :  { %269 = vst.msk [vmem:[#allocation2 + $0x88] sm:$0xff] %vm252_vm1, %v215_v20  ;;  %v219_v24 = vadd.f32 %v218_v23, %v2478_v28 }
 0x102   :  { %270 = vst [vmem:[#allocation2 + $0x90] sm:$0xff] %v2561_v22 }
 0x103   :  { %271 = vst.msk [vmem:[#allocation2 + $0x98] sm:$0xff] %vm252_vm1, %v219_v24  ;;  %v2038_v16 = vpop.eup %2037 }
 0x104   :  { %v2040_v17 = vpop.eup %2039  ;;  %v408_v19 = vadd.f32 1.0, %v2038_v16 }
 0x105   :  { %v222_v25 = vpop.f32.mrb[20].mxu0  ;;  %v409_v21 = vadd.f32 1.0, %v2040_v17 }
 0x106   :  { %v2568_v26 = vadd.f32 %v222_v25, %v2476_v27  ;;  %v224_v29 = vpop.f32.mrb[21].mxu0 }
 0x107   :  { %v225_v31 = vadd.f32 %v224_v29, %v2478_v28  ;;  %v226_v32 = vpop.f32.mrb[22].mxu0 }
 0x108   :  { %272 = vst [vmem:[#allocation2 + $0xa0] sm:$0xff] %v2568_v26  ;;  %v2573_v33 = vadd.f32 %v226_v32, %v2476_v27  ;;  %v228_v34 = vpop.f32.mrb[23].mxu0 }
 0x109   :  { %273 = vst.msk [vmem:[#allocation2 + $0xa8] sm:$0xff] %vm252_vm1, %v225_v31  ;;  %v229_v36 = vadd.f32 %v228_v34, %v2478_v28 }
 0x10a   :  { %274 = vst [vmem:[#allocation2 + $0xb0] sm:$0xff] %v2573_v33 }
 0x10b   :  { %275 = vst.msk [vmem:[#allocation2 + $0xb8] sm:$0xff] %vm252_vm1, %v229_v36 }
 0x10d   :  { %v232_v37 = vpop.f32.mrb[24].mxu0 }
 0x10e   :  { %v2580_v40 = vadd.f32 %v232_v37, %v2476_v27  ;;  %v234_v41 = vpop.f32.mrb[25].mxu0 }
 0x10f   :  { %v235_v43 = vadd.f32 %v234_v41, %v2478_v28  ;;  %v236_v45 = vpop.f32.mrb[26].mxu0 }
 0x110   :  { %276 = vst [vmem:[#allocation2 + $0xc0] sm:$0xff] %v2580_v40  ;;  %v2585_v47 = vadd.f32 %v236_v45, %v2476_v27  ;;  %v238_v48 = vpop.f32.mrb[27].mxu0 }
 0x111   :  { %277 = vst.msk [vmem:[#allocation2 + $0xc8] sm:$0xff] %vm252_vm1, %v235_v43  ;;  %v239_v49 = vadd.f32 %v238_v48, %v2478_v28 }
 0x112   :  { %278 = vst [vmem:[#allocation2 + $0xd0] sm:$0xff] %v2585_v47 }
 0x113   :  { %279 = vst.msk [vmem:[#allocation2 + $0xd8] sm:$0xff] %vm252_vm1, %v239_v49 }
 0x115   :  { %v242_v50 = vpop.f32.mrb[28].mxu0 }
 0x116   :  { %v243_v52 = vadd.f32 %v242_v50, %v2476_v27  ;;  %v244_v53 = vpop.f32.mrb[29].mxu0 }
 0x117   :  { %v245_v56 = vadd.f32 %v244_v53, %v2478_v28  ;;  %v246_v58 = vpop.f32.mrb[30].mxu0 }
 0x118   :  { %280 = vst [vmem:[#allocation2 + $0xe0] sm:$0xff] %v243_v52  ;;  %v247_v59 = vadd.f32 %v246_v58, %v2476_v27  ;;  %v248_v60 = vpop.f32.mrb[31].mxu0  ;;  %v452_v7 = vadd.f32 %v2500_v42, %v243_v52 }
 0x119   :  { %281 = vst.msk [vmem:[#allocation2 + $0xe8] sm:$0xff] %vm252_vm1, %v245_v56  ;;  %v249_v62 = vadd.f32 %v248_v60, %v2478_v28 }
 0x11a   :  { %282 = vst [vmem:[#allocation2 + $0xf0] sm:$0xff] %v247_v59  ;;  %v1883_v27 = vmul.f32 -1.442695, %v452_v7  ;;  %v453_v15 = vadd.f32 %v2520_v54, %v247_v59 }
 0x11b   :  { %283 = vst.msk [vmem:[#allocation2 + $0xf8] sm:$0xff] %vm252_vm1, %v249_v62 }
 0x11c   :  { %2041 = vpow2.f32 %v1883_v27  ;;  %v1884_v28 = vmul.f32 -1.442695, %v453_v15 }
 0x11e   :  { %2043 = vpow2.f32 %v1884_v28 }
 0x11f   :  { %2045 = vrcp.f32 %v408_v19 }
 0x120   :  { %2047 = vrcp.f32 %v409_v21  ;;  %v397_v53 = vld [vmem:[#allocation2 + $0xe8] sm:$0xff] }
 0x122   :  { %v399_v60 = vld [vmem:[#allocation2 + $0xf8] sm:$0xff] }
 0x123   :  { %v467_v9 = vadd.f32 %v399_v60, %v2524_v55 }
 0x125   :  { %v1886_v15 = vmul.f32 -1.442695, %v467_v9 }
 0x126   :  { %v2042_v20 = vpop.eup %2041 }
 0x127   :  { %v460_v23 = vadd.f32 1.0, %v2042_v20 }
 0x128   :  { %v2044_v24 = vpop.eup %2043 }
 0x129   :  { %2049 = vrcp.f32 %v460_v23  ;;  %v461_v42 = vadd.f32 1.0, %v2044_v24  ;;  %v2046_v25 = vpop.eup %2045 }
 0x12a   :  { %v2048_v32 = vpop.eup %2047  ;;  %v436_v21 = vsub.f32 1.0, %v2046_v25 }
 0x12b   :  { %2051 = vrcp.f32 %v461_v42  ;;  %v437_v42 = vsub.f32 1.0, %v2048_v32 }
 0x133   :  { %v2050_v34 = vpop.eup %2049 }
 0x135   :  { %v2052_v45 = vpop.eup %2051 }
 0x15b   :  { %v417_v29 = vpop.permute.xlu0 %416 }
 0x15c   :  { %v422_v31 = vmul.f32 %v2046_v25, %v417_v29  ;;  %v483_v54 = vpop.permute.xlu1 %482 }
 0x15d   :  { %v488_v37 = vmul.f32 %v2050_v34, %v483_v54  ;;  %v449_v54 = vmul.f32 0.0, %v2048_v32 }
 0x15e   :  { %426 = vrot.lane.b32.xlu0 %v422_v31, %s2319_s3 }
 0x15f   :  { %v419_v36 = vpop.permute.xlu0 %418 }
 0x160   :  { %v423_v41 = vmul.f32 %v2048_v32, %v419_v36  ;;  %v485_v43 = vpop.permute.xlu1 %484 }
 0x161   :  { %v489_v48 = vmul.f32 %v2052_v45, %v485_v43 }
 0x162   :  { %428 = vrot.lane.b32.xlu1 %v423_v41, %s2319_s3  ;;  %492 = vrot.lane.b32.xlu0 %v488_v37, %s2319_s3 }
 0x166   :  { %494 = vrot.lane.b32.xlu1 %v489_v48, %s2319_s3 }
 0x1d0   :  { %v427_v49 = vpop.permute.xlu0 %426 }
 0x1d1   :  { %v432_v50 = vadd.f32 %v427_v49, %v2481_v30 }
 0x1d3   :  { %2053 = vtanh.f32 %v432_v50 }
 0x1d4   :  { %v429_v52 = vpop.permute.xlu1 %428  ;;  %v493_v56 = vpop.permute.xlu0 %492 }
 0x1d5   :  { %v433_v58 = vadd.f32 %v429_v52, %v2489_v35  ;;  %v498_v59 = vadd.f32 %v493_v56, %v397_v53  ;;  %v466_v35 = vadd.f32 %v397_v53, %v2506_v46  ;;  %v448_v46 = vmul.f32 0.0, %v2046_v25 }
 0x1d7   :  { %2055 = vtanh.f32 %v433_v58  ;;  %v1885_v27 = vmul.f32 -1.442695, %v466_v35 }
 0x1d8   :  { %2057 = vtanh.f32 %v498_v59  ;;  %v495_v62 = vpop.permute.xlu1 %494 }
 0x1d9   :  { %v499_v63 = vadd.f32 %v495_v62, %v399_v60 }
 0x1db   :  { %2059 = vtanh.f32 %v499_v63 }
 0x1dc   :  { %2061 = vpow2.f32 %v1885_v27 }
 0x1dd   :  { %v2054_v0 = vpop.eup %2053  ;;  %2063 = vpow2.f32 %v1886_v15 }
 0x1de   :  { %440 = vrot.lane.b32.xlu0 %v2054_v0, %s2320_s4 }
 0x1e1   :  { %v2056_v5 = vpop.eup %2055 }
 0x1e2   :  { %v2058_v7 = vpop.eup %2057  ;;  %442 = vrot.lane.b32.xlu1 %v2056_v5, %s2320_s4 }
 0x1e3   :  { %506 = vrot.lane.b32.xlu0 %v2058_v7, %s2320_s4 }
 0x1e5   :  { %v2060_v30 = vpop.eup %2059 }
 0x1e6   :  { %508 = vrot.lane.b32.xlu1 %v2060_v30, %s2320_s4  ;;  %v2062_v28 = vpop.eup %2061 }
 0x1e7   :  { %v2064_v16 = vpop.eup %2063  ;;  %v474_v17 = vadd.f32 1.0, %v2062_v28 }
 0x1e8   :  { %v475_v19 = vadd.f32 1.0, %v2064_v16 }
 0x1e9   :  { %2065 = vrcp.f32 %v474_v17 }
 0x1ea   :  { %2067 = vrcp.f32 %v475_v19 }
 0x1f3   :  { %v2066_v23 = vpop.eup %2065 }
 0x1f4   :  { %v2068_v29 = vpop.eup %2067  ;;  %v502_v34 = vsub.f32 1.0, %v2066_v23  ;;  %v514_v49 = vmul.f32 0.0, %v2066_v23 }
 0x1f5   :  { %v503_v45 = vsub.f32 1.0, %v2068_v29  ;;  %v515_v50 = vmul.f32 0.0, %v2068_v29 }
 0x250   :  { %v441_v20 = vpop.permute.xlu0 %440 }
 0x251   :  { %v446_v24 = vmul.f32 %v441_v20, %v436_v21 }
 0x253   :  { %v2615_v37 = vadd.f32 %v448_v46, %v446_v24 }
 0x254   :  { %v443_v31 = vpop.permute.xlu1 %442 }
 0x255   :  { %v447_v55 = vmul.f32 %v443_v31, %v437_v42  ;;  %v507_v36 = vpop.permute.xlu0 %506 }
 0x256   :  { %v512_v43 = vmul.f32 %v507_v36, %v502_v34 }
 0x257   :  { %v2617_v41 = vadd.f32 %v449_v54, %v447_v55 }
 0x258   :  { %v509_v48 = vpop.permute.xlu1 %508  ;;  %v2621_v56 = vadd.f32 %v514_v49, %v512_v43 }
 0x259   :  { %v513_v52 = vmul.f32 %v509_v48, %v503_v45  ;;  %v1941_v53 = vpack.i.bf16 %v2617_v41, %v2615_v37 }
 0x25b   :  { %v2623_v25 = vadd.f32 %v515_v50, %v513_v52  ;;  %1942 = vrot.lane.b32.xlu0 %v1941_v53, %s2320_s4 }
 0x25d   :  { %v1946_v32 = vpack.i.bf16 %v2623_v25, %v2621_v56 }
 0x25f   :  { %1947 = vrot.lane.b32.xlu1 %v1946_v32, %s2321_s10 }
 0x2cd   :  { %v1943_v58 = vpop.permute.xlu0 %1942 }
 0x2ce   :  { %v1945_v60 = vunpack.i.h.bf16 %v1943_v58  ;;  %v1944_v62 = vunpack.i.l.bf16 %v1943_v58 }
 0x2d1   :  { %v1948_v59 = vpop.permute.xlu1 %1947 }
 0x2d2   :  { %v1950_v63 = vunpack.i.h.bf16 %v1948_v59  ;;  %v1949_v0 = vunpack.i.l.bf16 %v1948_v59 }
 0x2d4   :  { %v534_v5 = vsel %vm113_vm0, %v1944_v62, %v1949_v0  ;;  %v535_v7 = vsel %vm113_vm0, %v1945_v60, %v1950_v63 }
 0x2d5   :  { %v536_v30 = vpack.c.bf16 %v535_v7, %v534_v5 }
 0x2d7   :  { %1887 = vmatmul.mubr.msk.bf16.vlgmr.msra.gmra.mrb[4].mxu1 %vm252_vm1, %v536_v30 }
 0x2d8   :  { %734 = vmatpush1.bf16.msra.mxu1 %v2368_v4  ;;  %765 = vmatprep.mubr.bf16.mxu1 %v2317_v1 }
 0x2d9   :  { %735 = vmatprep.subr.bf16.mxu1 %v2378_v6 }
 0x2dc   :  { %736 = vmatpush1.bf16.msra.mxu1 %v2386_v8 }
 0x2dd   :  { %737 = vmatprep.subr.bf16.mxu1 %v2395_v10 }
 0x2e0   :  { %738 = vmatpush1.bf16.msra.mxu1 %v2401_v11 }
 0x2e1   :  { %739 = vmatprep.subr.bf16.mxu1 %v2407_v12 }
 0x2e4   :  { %740 = vmatpush1.bf16.msra.mxu1 %v2415_v13 }
 0x2e5   :  { %926 = vmatprep.subr.bf16.mxu1 %v2360_v2 }
 0x3aa   :  { %v574_v35 = vpop.f32.mrb[4].mxu1 }
 0x3ab   :  { %v575_v9 = vadd.f32 %v574_v35, %v2494_v38  ;;  %v576_v27 = vpop.f32.mrb[5].mxu1 }
 0x3ac   :  { %v578_v15 = vpop.f32.mrb[6].mxu1  ;;  %v2645_v17 = vadd.f32 %v576_v27, %v2496_v39 }
 0x3ad   :  { %v579_v28 = vadd.f32 %v578_v15, %v2494_v38  ;;  %v580_v16 = vpop.f32.mrb[7].mxu1  ;;  %609 = vrot.lane.b32.xlu0 %v575_v9, %s2319_s3  ;;  %v593_v20 = vadd.f32 %v575_v9, %v2503_v44  ;;  %v645_v24 = vadd.f32 %v575_v9, %v2580_v40  ;;  %v590_v9 = vld [vmem:[#allocation2 + $0xc8] sm:$0xff] }
 0x3ae   :  { %v2649_v19 = vadd.f32 %v580_v16, %v2496_v39 }
 0x3af   :  { %611 = vrot.lane.b32.xlu1 %v579_v28, %s2319_s3  ;;  %v594_v21 = vadd.f32 %v579_v28, %v2513_v51  ;;  %v1888_v23 = vmul.f32 -1.442695, %v593_v20  ;;  %v646_v29 = vadd.f32 %v579_v28, %v2585_v47  ;;  %v1890_v31 = vmul.f32 -1.442695, %v645_v24  ;;  %v592_v28 = vld [vmem:[#allocation2 + $0xd8] sm:$0xff] }
 0x3b1   :  { %675 = vrot.lane.b32.xlu0 %v2645_v17, %s2319_s3  ;;  %v1889_v42 = vmul.f32 -1.442695, %v594_v21  ;;  %2069 = vpow2.f32 %v1888_v23  ;;  %v1891_v46 = vmul.f32 -1.442695, %v646_v29 }
 0x3b3   :  { %677 = vrot.lane.b32.xlu1 %v2649_v19, %s2319_s3  ;;  %2071 = vpow2.f32 %v1889_v42  ;;  %v660_v42 = vadd.f32 %v592_v28, %v2649_v19 }
 0x3b4   :  { %2073 = vpow2.f32 %v1890_v31 }
 0x3b5   :  { %2075 = vpow2.f32 %v1891_v46  ;;  %v1893_v31 = vmul.f32 -1.442695, %v660_v42 }
 0x3bb   :  { %v2070_v54 = vpop.eup %2069 }
 0x3bc   :  { %v601_v34 = vadd.f32 1.0, %v2070_v54 }
 0x3bd   :  { %v2072_v55 = vpop.eup %2071 }
 0x3be   :  { %v2074_v36 = vpop.eup %2073  ;;  %v602_v43 = vadd.f32 1.0, %v2072_v55  ;;  %2077 = vrcp.f32 %v601_v34 }
 0x3bf   :  { %v2076_v45 = vpop.eup %2075  ;;  %v653_v48 = vadd.f32 1.0, %v2074_v36 }
 0x3c0   :  { %2079 = vrcp.f32 %v602_v43  ;;  %v654_v49 = vadd.f32 1.0, %v2076_v45 }
 0x3c1   :  { %2081 = vrcp.f32 %v653_v48 }
 0x3c2   :  { %2083 = vrcp.f32 %v654_v49 }
 0x3c8   :  { %v2078_v40 = vpop.eup %2077 }
 0x3c9   :  { %v629_v36 = vsub.f32 1.0, %v2078_v40 }
 0x3ca   :  { %v2080_v52 = vpop.eup %2079 }
 0x3cb   :  { %v2082_v58 = vpop.eup %2081  ;;  %v630_v49 = vsub.f32 1.0, %v2080_v52  ;;  %v642_v19 = vmul.f32 %v2080_v52, %v2617_v41 }
 0x3cc   :  { %v2084_v62 = vpop.eup %2083 }
 0x41f   :  { %v610_v47 = vpop.permute.xlu0 %609 }
 0x420   :  { %v615_v50 = vmul.f32 %v2078_v40, %v610_v47 }
 0x421   :  { %v612_v53 = vpop.permute.xlu1 %611 }
 0x422   :  { %v616_v32 = vmul.f32 %v2080_v52, %v612_v53  ;;  %619 = vrot.lane.b32.xlu0 %v615_v50, %s2319_s3 }
 0x423   :  { %v676_v59 = vpop.permute.xlu0 %675 }
 0x424   :  { %v681_v60 = vmul.f32 %v2082_v58, %v676_v59  ;;  %621 = vrot.lane.b32.xlu1 %v616_v32, %s2319_s3 }
 0x425   :  { %v678_v63 = vpop.permute.xlu1 %677 }
 0x426   :  { %v682_v0 = vmul.f32 %v2084_v62, %v678_v63  ;;  %685 = vrot.lane.b32.xlu0 %v681_v60, %s2319_s3 }
 0x428   :  { %687 = vrot.lane.b32.xlu1 %v682_v0, %s2319_s3 }
 0x494   :  { %v620_v5 = vpop.permute.xlu0 %619 }
 0x495   :  { %v625_v7 = vadd.f32 %v620_v5, %v2503_v44 }
 0x496   :  { %v622_v30 = vpop.permute.xlu1 %621 }
 0x497   :  { %2085 = vtanh.f32 %v625_v7  ;;  %v626_v35 = vadd.f32 %v622_v30, %v2513_v51  ;;  %v659_v51 = vadd.f32 %v590_v9, %v2645_v17  ;;  %v641_v17 = vmul.f32 %v2078_v40, %v2615_v37 }
 0x498   :  { %v686_v27 = vpop.permute.xlu0 %685 }
 0x499   :  { %2087 = vtanh.f32 %v626_v35  ;;  %v691_v15 = vadd.f32 %v686_v27, %v590_v9  ;;  %v1892_v29 = vmul.f32 -1.442695, %v659_v51 }
 0x49a   :  { %v688_v16 = vpop.permute.xlu1 %687 }
 0x49b   :  { %2089 = vtanh.f32 %v691_v15  ;;  %v692_v20 = vadd.f32 %v688_v16, %v592_v28 }
 0x49d   :  { %2091 = vtanh.f32 %v692_v20 }
 0x49e   :  { %2093 = vpow2.f32 %v1892_v29 }
 0x49f   :  { %2095 = vpow2.f32 %v1893_v31 }
 0x4a1   :  { %v2086_v21 = vpop.eup %2085 }
 0x4a2   :  { %633 = vrot.lane.b32.xlu0 %v2086_v21, %s2320_s4 }
 0x4a3   :  { %v2088_v23 = vpop.eup %2087 }
 0x4a4   :  { %635 = vrot.lane.b32.xlu1 %v2088_v23, %s2320_s4 }
 0x4a5   :  { %v2090_v44 = vpop.eup %2089 }
 0x4a6   :  { %699 = vrot.lane.b32.xlu0 %v2090_v44, %s2320_s4 }
 0x4a7   :  { %v2092_v24 = vpop.eup %2091 }
 0x4a8   :  { %701 = vrot.lane.b32.xlu1 %v2092_v24, %s2320_s4  ;;  %v2094_v46 = vpop.eup %2093 }
 0x4a9   :  { %v2096_v54 = vpop.eup %2095  ;;  %v667_v55 = vadd.f32 1.0, %v2094_v46 }
 0x4aa   :  { %v668_v34 = vadd.f32 1.0, %v2096_v54 }
 0x4ab   :  { %2097 = vrcp.f32 %v667_v55 }
 0x4ac   :  { %2099 = vrcp.f32 %v668_v34 }
 0x4b5   :  { %v2098_v43 = vpop.eup %2097 }
 0x4b6   :  { %v2100_v47 = vpop.eup %2099  ;;  %v695_v32 = vsub.f32 1.0, %v2098_v43  ;;  %v707_v5 = vmul.f32 %v2098_v43, %v2621_v56 }
 0x4b7   :  { %v696_v63 = vsub.f32 1.0, %v2100_v47  ;;  %v708_v7 = vmul.f32 %v2100_v47, %v2623_v25 }
 0x514   :  { %v634_v45 = vpop.permute.xlu0 %633 }
 0x515   :  { %v639_v48 = vmul.f32 %v634_v45, %v629_v36 }
 0x516   :  { %v636_v50 = vpop.permute.xlu1 %635 }
 0x517   :  { %v640_v53 = vmul.f32 %v636_v50, %v630_v49  ;;  %v2673_v59 = vadd.f32 %v641_v17, %v639_v48 }
 0x518   :  { %v700_v58 = vpop.permute.xlu0 %699 }
 0x519   :  { %v2675_v60 = vadd.f32 %v642_v19, %v640_v53  ;;  %v705_v62 = vmul.f32 %v700_v58, %v695_v32 }
 0x51a   :  { %v702_v0 = vpop.permute.xlu1 %701 }
 0x51b   :  { %v706_v30 = vmul.f32 %v702_v0, %v696_v63  ;;  %v1951_v37 = vpack.i.bf16 %v2675_v60, %v2673_v59  ;;  %v2681_v40 = vadd.f32 %v707_v5, %v705_v62 }
 0x51d   :  { %v2683_v41 = vadd.f32 %v708_v7, %v706_v30  ;;  %1952 = vrot.lane.b32.xlu0 %v1951_v37, %s2320_s4  ;;  %v783_v37 = vld [vmem:[#allocation2 + $0xa8] sm:$0xff] }
 0x51f   :  { %v1956_v52 = vpack.i.bf16 %v2683_v41, %v2681_v40 }
 0x521   :  { %1957 = vrot.lane.b32.xlu1 %v1956_v52, %s2321_s10 }
 0x58f   :  { %v1953_v35 = vpop.permute.xlu0 %1952 }
 0x590   :  { %v1955_v56 = vunpack.i.h.bf16 %v1953_v35  ;;  %v1954_v27 = vunpack.i.l.bf16 %v1953_v35 }
 0x593   :  { %v1958_v9 = vpop.permute.xlu1 %1957 }
 0x594   :  { %v1960_v25 = vunpack.i.h.bf16 %v1958_v9  ;;  %v1959_v15 = vunpack.i.l.bf16 %v1958_v9  ;;  %v785_v9 = vld [vmem:[#allocation2 + $0xb8] sm:$0xff] }
 0x596   :  { %v727_v28 = vsel %vm113_vm0, %v1954_v27, %v1959_v15  ;;  %v728_v16 = vsel %vm113_vm0, %v1955_v56, %v1960_v25 }
 0x597   :  { %v729_v20 = vpack.c.bf16 %v728_v16, %v727_v28 }
 0x599   :  { %1894 = vmatmul.mubr.msk.bf16.vlgmr.msra.gmra.mrb[8].mxu1 %vm252_vm1, %v729_v20 }
 0x59a   :  { %927 = vmatpush1.bf16.msra.mxu1 %v2368_v4  ;;  %958 = vmatprep.mubr.bf16.mxu1 %v2317_v1 }
 0x59b   :  { %928 = vmatprep.subr.bf16.mxu1 %v2378_v6 }
 0x59e   :  { %929 = vmatpush1.bf16.msra.mxu1 %v2386_v8 }
 0x59f   :  { %930 = vmatprep.subr.bf16.mxu1 %v2395_v10 }
 0x5a2   :  { %931 = vmatpush1.bf16.msra.mxu1 %v2401_v11 }
 0x5a3   :  { %932 = vmatprep.subr.bf16.mxu1 %v2407_v12 }
 0x5a6   :  { %933 = vmatpush1.bf16.msra.mxu1 %v2415_v13 }
 0x5a7   :  { %1302 = vmatprep.subr.bf16.mxu1 %v2360_v2 }
 0x66c   :  { %v767_v21 = vpop.f32.mrb[8].mxu1 }
 0x66d   :  { %v768_v23 = vadd.f32 %v767_v21, %v2494_v38  ;;  %v769_v4 = vpop.f32.mrb[9].mxu1 }
 0x66e   :  { %v771_v44 = vpop.f32.mrb[10].mxu1  ;;  %v2705_v8 = vadd.f32 %v769_v4, %v2496_v39 }
 0x66f   :  { %v772_v24 = vadd.f32 %v771_v44, %v2494_v38  ;;  %v773_v6 = vpop.f32.mrb[11].mxu1  ;;  %802 = vrot.lane.b32.xlu0 %v768_v23, %s2319_s3  ;;  %v786_v2 = vadd.f32 %v768_v23, %v2532_v57  ;;  %v838_v13 = vadd.f32 %v768_v23, %v2568_v26 }
 0x670   :  { %v2709_v10 = vadd.f32 %v773_v6, %v2496_v39 }
 0x671   :  { %804 = vrot.lane.b32.xlu1 %v772_v24, %s2319_s3  ;;  %v787_v11 = vadd.f32 %v772_v24, %v2537_v61  ;;  %v1895_v12 = vmul.f32 -1.442695, %v786_v2  ;;  %v839_v42 = vadd.f32 %v772_v24, %v2573_v33  ;;  %v1897_v29 = vmul.f32 -1.442695, %v838_v13 }
 0x672   :  { %v853_v16 = vadd.f32 %v785_v9, %v2709_v10 }
 0x673   :  { %868 = vrot.lane.b32.xlu0 %v2705_v8, %s2319_s3  ;;  %v1896_v51 = vmul.f32 -1.442695, %v787_v11  ;;  %2101 = vpow2.f32 %v1895_v12  ;;  %v1898_v31 = vmul.f32 -1.442695, %v839_v42 }
 0x674   :  { %v1900_v21 = vmul.f32 -1.442695, %v853_v16 }
 0x675   :  { %870 = vrot.lane.b32.xlu1 %v2709_v10, %s2319_s3  ;;  %2103 = vpow2.f32 %v1896_v51 }
 0x676   :  { %2105 = vpow2.f32 %v1897_v29 }
 0x677   :  { %2107 = vpow2.f32 %v1898_v31 }
 0x67d   :  { %v2102_v46 = vpop.eup %2101 }
 0x67e   :  { %v794_v55 = vadd.f32 1.0, %v2102_v46 }
 0x67f   :  { %v2104_v54 = vpop.eup %2103 }
 0x680   :  { %v2106_v34 = vpop.eup %2105  ;;  %v795_v36 = vadd.f32 1.0, %v2104_v54  ;;  %2109 = vrcp.f32 %v794_v55 }
 0x681   :  { %v2108_v43 = vpop.eup %2107  ;;  %v846_v45 = vadd.f32 1.0, %v2106_v34 }
 0x682   :  { %2111 = vrcp.f32 %v795_v36  ;;  %v847_v48 = vadd.f32 1.0, %v2108_v43 }
 0x683   :  { %2113 = vrcp.f32 %v846_v45 }
 0x684   :  { %2115 = vrcp.f32 %v847_v48 }
 0x68a   :  { %v2110_v26 = vpop.eup %2109 }
 0x68b   :  { %v822_v6 = vsub.f32 1.0, %v2110_v26 }
 0x68c   :  { %v2112_v47 = vpop.eup %2111 }
 0x68d   :  { %v2114_v19 = vpop.eup %2113  ;;  %v823_v13 = vsub.f32 1.0, %v2112_v47  ;;  %v835_v10 = vmul.f32 %v2112_v47, %v2675_v60 }
 0x68e   :  { %v2116_v58 = vpop.eup %2115 }
 0x6e1   :  { %v803_v33 = vpop.permute.xlu0 %802 }
 0x6e2   :  { %v808_v49 = vmul.f32 %v2110_v26, %v803_v33 }
 0x6e3   :  { %v805_v50 = vpop.permute.xlu1 %804 }
 0x6e4   :  { %v809_v17 = vmul.f32 %v2112_v47, %v805_v50  ;;  %812 = vrot.lane.b32.xlu0 %v808_v49, %s2319_s3 }
 0x6e5   :  { %v869_v53 = vpop.permute.xlu0 %868 }
 0x6e6   :  { %v874_v32 = vmul.f32 %v2114_v19, %v869_v53  ;;  %814 = vrot.lane.b32.xlu1 %v809_v17, %s2319_s3 }
 0x6e7   :  { %v871_v62 = vpop.permute.xlu1 %870 }
 0x6e8   :  { %v875_v63 = vmul.f32 %v2116_v58, %v871_v62  ;;  %878 = vrot.lane.b32.xlu0 %v874_v32, %s2319_s3  ;;  %v2755_v62 = vld [vmem:[%s3046_s2] ss:$8 sps:$4 sm:$0xff]  }
 0x6ea   :  { %880 = vrot.lane.b32.xlu1 %v875_v63, %s2319_s3  ;;  %v2762_v63 = vld [vmem:[%s3046_s2 + $0x14] ss:$8 sps:$4 sm:$0xff]  }
 0x756   :  { %v813_v0 = vpop.permute.xlu0 %812 }
 0x757   :  { %v818_v5 = vadd.f32 %v813_v0, %v2532_v57  ;;  %v2768_v0 = vld [vmem:[%s3046_s2 + $0x10] ss:$8 sps:$4 sm:$0xff]  }
 0x758   :  { %v815_v7 = vpop.permute.xlu1 %814 }
 0x759   :  { %2117 = vtanh.f32 %v818_v5  ;;  %v819_v30 = vadd.f32 %v815_v7, %v2537_v61  ;;  %v852_v61 = vadd.f32 %v783_v37, %v2705_v8  ;;  %v834_v8 = vmul.f32 %v2110_v26, %v2673_v59  ;;  %v2774_v5 = vld [vmem:[%s3046_s2 + $0x24] ss:$8 sps:$4 sm:$0xff]   ;;  %v2780_v7 = vld [vmem:[%s3046_s2 + $0x20] ss:$8 sps:$4 sm:$0xff]  }
 0x75a   :  { %v879_v52 = vpop.permute.xlu0 %878 }
 0x75b   :  { %2119 = vtanh.f32 %v819_v30  ;;  %v884_v35 = vadd.f32 %v879_v52, %v783_v37  ;;  %v1899_v20 = vmul.f32 -1.442695, %v852_v61  ;;  %v2786_v30 = vld [vmem:[%s3046_s2 + $0x34] ss:$8 sps:$4 sm:$0xff]   ;;  %v2792_v37 = vld [vmem:[%s3046_s2 + $0x30] ss:$8 sps:$4 sm:$0xff]  }
 0x75c   :  { %v881_v56 = vpop.permute.xlu1 %880  ;;  %v2300_v52 = vld [vmem:[%s3046_s2 + $0x4] ss:$8 sps:$4 sm:$0xff]  }
 0x75d   :  { %2121 = vtanh.f32 %v884_v35  ;;  %v885_v27 = vadd.f32 %v881_v56, %v785_v9 }
 0x75f   :  { %2123 = vtanh.f32 %v885_v27 }
 0x760   :  { %2125 = vpow2.f32 %v1899_v20 }
 0x761   :  { %2127 = vpow2.f32 %v1900_v21 }
 0x763   :  { %v2118_v25 = vpop.eup %2117 }
 0x764   :  { %826 = vrot.lane.b32.xlu0 %v2118_v25, %s2320_s4 }
 0x765   :  { %v2120_v15 = vpop.eup %2119 }
 0x766   :  { %828 = vrot.lane.b32.xlu1 %v2120_v15, %s2320_s4 }
 0x767   :  { %v2122_v57 = vpop.eup %2121 }
 0x768   :  { %892 = vrot.lane.b32.xlu0 %v2122_v57, %s2320_s4 }
 0x769   :  { %v2124_v28 = vpop.eup %2123 }
 0x76a   :  { %894 = vrot.lane.b32.xlu1 %v2124_v28, %s2320_s4  ;;  %v2126_v23 = vpop.eup %2125 }
 0x76b   :  { %v2128_v4 = vpop.eup %2127  ;;  %v860_v44 = vadd.f32 1.0, %v2126_v23 }
 0x76c   :  { %v861_v24 = vadd.f32 1.0, %v2128_v4 }
 0x76d   :  { %2129 = vrcp.f32 %v860_v44 }
 0x76e   :  { %2131 = vrcp.f32 %v861_v24 }
 0x777   :  { %v2130_v2 = vpop.eup %2129 }
 0x778   :  { %v2132_v51 = vpop.eup %2131  ;;  %v888_v31 = vsub.f32 1.0, %v2130_v2  ;;  %v900_v45 = vmul.f32 %v2130_v2, %v2681_v40 }
 0x779   :  { %v889_v36 = vsub.f32 1.0, %v2132_v51  ;;  %v901_v48 = vmul.f32 %v2132_v51, %v2683_v41 }
 0x7d6   :  { %v827_v11 = vpop.permute.xlu0 %826 }
 0x7d7   :  { %v832_v12 = vmul.f32 %v827_v11, %v822_v6 }
 0x7d8   :  { %v829_v42 = vpop.permute.xlu1 %828 }
 0x7d9   :  { %v833_v29 = vmul.f32 %v829_v42, %v823_v13  ;;  %v2733_v54 = vadd.f32 %v834_v8, %v832_v12 }
 0x7da   :  { %v893_v46 = vpop.permute.xlu0 %892 }
 0x7db   :  { %v2735_v55 = vadd.f32 %v835_v10, %v833_v29  ;;  %v898_v34 = vmul.f32 %v893_v46, %v888_v31 }
 0x7dc   :  { %v895_v43 = vpop.permute.xlu1 %894 }
 0x7dd   :  { %v899_v33 = vmul.f32 %v895_v43, %v889_v36  ;;  %v1961_v59 = vpack.i.bf16 %v2735_v55, %v2733_v54  ;;  %v2741_v26 = vadd.f32 %v900_v45, %v898_v34 }
 0x7df   :  { %v2743_v60 = vadd.f32 %v901_v48, %v899_v33  ;;  %1962 = vrot.lane.b32.xlu0 %v1961_v59, %s2320_s4 }
 0x7e1   :  { %v1966_v49 = vpack.i.bf16 %v2743_v60, %v2741_v26 }
 0x7e3   :  { %1967 = vrot.lane.b32.xlu1 %v1966_v49, %s2321_s10 }
 0x851   :  { %v1963_v47 = vpop.permute.xlu0 %1962 }
 0x852   :  { %v1965_v40 = vunpack.i.h.bf16 %v1963_v47  ;;  %v1964_v17 = vunpack.i.l.bf16 %v1963_v47 }
 0x855   :  { %v1968_v50 = vpop.permute.xlu1 %1967 }
 0x856   :  { %v1970_v41 = vunpack.i.h.bf16 %v1968_v50  ;;  %v1969_v19 = vunpack.i.l.bf16 %v1968_v50 }
 0x858   :  { %v920_v53 = vsel %vm113_vm0, %v1964_v17, %v1969_v19  ;;  %v921_v32 = vsel %vm113_vm0, %v1965_v40, %v1970_v41  ;;  %v976_v40 = vld [vmem:[#allocation2 + $0x88] sm:$0xff]  ;;  %v978_v19 = vld [vmem:[#allocation2 + $0x98] sm:$0xff] }
 0x859   :  { %v922_v58 = vpack.c.bf16 %v921_v32, %v920_v53 }
 0x85b   :  { %1901 = vmatmul.mubr.msk.bf16.vlgmr.msra.gmra.mrb[12].mxu1 %vm252_vm1, %v922_v58 }
 0x85c   :  { %1303 = vmatpush1.bf16.msra.mxu1 %v2755_v62  ;;  %1334 = vmatprep.mubr.bf16.mxu1 %v2317_v1 }
 0x85d   :  { %1304 = vmatprep.subr.bf16.mxu1 %v2762_v63 }
 0x860   :  { %1305 = vmatpush1.bf16.msra.mxu1 %v2768_v0 }
 0x861   :  { %1306 = vmatprep.subr.bf16.mxu1 %v2774_v5 }
 0x864   :  { %1307 = vmatpush1.bf16.msra.mxu1 %v2780_v7 }
 0x865   :  { %1308 = vmatprep.subr.bf16.mxu1 %v2786_v30 }
 0x868   :  { %1309 = vmatpush1.bf16.msra.mxu1 %v2792_v37 }
 0x869   :  { %1668 = vmatprep.subr.bf16.mxu1 %v2300_v52 }
 0x92e   :  { %v960_v35 = vpop.f32.mrb[12].mxu1 }
 0x92f   :  { %v961_v9 = vadd.f32 %v960_v35, %v2494_v38  ;;  %v962_v56 = vpop.f32.mrb[13].mxu1 }
 0x930   :  { %v964_v27 = vpop.f32.mrb[14].mxu1  ;;  %v2802_v57 = vadd.f32 %v962_v56, %v2496_v39 }
 0x931   :  { %v965_v25 = vadd.f32 %v964_v27, %v2494_v38  ;;  %v966_v15 = vpop.f32.mrb[15].mxu1  ;;  %995 = vrot.lane.b32.xlu0 %v961_v9, %s2319_s3  ;;  %v979_v61 = vadd.f32 %v961_v9, %v2544_v3  ;;  %v1031_v21 = vadd.f32 %v961_v9, %v2556_v18 }
 0x932   :  { %v2806_v28 = vadd.f32 %v966_v15, %v2496_v39 }
 0x933   :  { %997 = vrot.lane.b32.xlu1 %v965_v25, %s2319_s3  ;;  %v980_v16 = vadd.f32 %v965_v25, %v2549_v14  ;;  %v1902_v20 = vmul.f32 -1.442695, %v979_v61  ;;  %v1032_v4 = vadd.f32 %v965_v25, %v2561_v22  ;;  %v1904_v44 = vmul.f32 -1.442695, %v1031_v21 }
 0x934   :  { %v1046_v9 = vadd.f32 %v978_v19, %v2806_v28 }
 0x935   :  { %1061 = vrot.lane.b32.xlu0 %v2802_v57, %s2319_s3  ;;  %v1903_v23 = vmul.f32 -1.442695, %v980_v16  ;;  %2133 = vpow2.f32 %v1902_v20  ;;  %v1905_v24 = vmul.f32 -1.442695, %v1032_v4 }
 0x936   :  { %v1907_v27 = vmul.f32 -1.442695, %v1046_v9 }
 0x937   :  { %1063 = vrot.lane.b32.xlu1 %v2806_v28, %s2319_s3  ;;  %2135 = vpow2.f32 %v1903_v23 }
 0x938   :  { %2137 = vpow2.f32 %v1904_v44 }
 0x939   :  { %2139 = vpow2.f32 %v1905_v24 }
 0x93f   :  { %v2134_v6 = vpop.eup %2133 }
 0x940   :  { %v987_v11 = vadd.f32 1.0, %v2134_v6 }
 0x941   :  { %v2136_v2 = vpop.eup %2135 }
 0x942   :  { %v2138_v12 = vpop.eup %2137  ;;  %v988_v13 = vadd.f32 1.0, %v2136_v2  ;;  %2141 = vrcp.f32 %v987_v11 }
 0x943   :  { %v2140_v51 = vpop.eup %2139  ;;  %v1039_v42 = vadd.f32 1.0, %v2138_v12 }
 0x944   :  { %2143 = vrcp.f32 %v988_v13  ;;  %v1040_v8 = vadd.f32 1.0, %v2140_v51 }
 0x945   :  { %2145 = vrcp.f32 %v1039_v42 }
 0x946   :  { %2147 = vrcp.f32 %v1040_v8 }
 0x94c   :  { %v2142_v18 = vpop.eup %2141 }
 0x94d   :  { %v1015_v20 = vsub.f32 1.0, %v2142_v18 }
 0x94e   :  { %v2144_v29 = vpop.eup %2143 }
 0x94f   :  { %v2146_v34 = vpop.eup %2145  ;;  %v1016_v44 = vsub.f32 1.0, %v2144_v29  ;;  %v1028_v28 = vmul.f32 %v2144_v29, %v2735_v55 }
 0x950   :  { %v2148_v45 = vpop.eup %2147 }
 0x9a3   :  { %v996_v22 = vpop.permute.xlu0 %995 }
 0x9a4   :  { %v1001_v10 = vmul.f32 %v2142_v18, %v996_v22 }
 0x9a5   :  { %v998_v31 = vpop.permute.xlu1 %997 }
 0x9a6   :  { %v1002_v46 = vmul.f32 %v2144_v29, %v998_v31  ;;  %1005 = vrot.lane.b32.xlu0 %v1001_v10, %s2319_s3 }
 0x9a7   :  { %v1062_v36 = vpop.permute.xlu0 %1061 }
 0x9a8   :  { %v1067_v43 = vmul.f32 %v2146_v34, %v1062_v36  ;;  %1007 = vrot.lane.b32.xlu1 %v1002_v46, %s2319_s3 }
 0x9a9   :  { %v1064_v48 = vpop.permute.xlu1 %1063 }
 0x9aa   :  { %v1068_v33 = vmul.f32 %v2148_v45, %v1064_v48  ;;  %1071 = vrot.lane.b32.xlu0 %v1067_v43, %s2319_s3 }
 0x9ac   :  { %1073 = vrot.lane.b32.xlu1 %v1068_v33, %s2319_s3 }
 0xa18   :  { %v1006_v59 = vpop.permute.xlu0 %1005 }
 0xa19   :  { %v1011_v49 = vadd.f32 %v1006_v59, %v2544_v3 }
 0xa1a   :  { %v1008_v47 = vpop.permute.xlu1 %1007 }
 0xa1b   :  { %2149 = vtanh.f32 %v1011_v49  ;;  %v1012_v50 = vadd.f32 %v1008_v47, %v2549_v14  ;;  %v1045_v14 = vadd.f32 %v976_v40, %v2802_v57  ;;  %v1027_v57 = vmul.f32 %v2142_v18, %v2733_v54 }
 0xa1c   :  { %v1072_v17 = vpop.permute.xlu0 %1071 }
 0xa1d   :  { %2151 = vtanh.f32 %v1012_v50  ;;  %v1077_v41 = vadd.f32 %v1072_v17, %v976_v40  ;;  %v1906_v56 = vmul.f32 -1.442695, %v1045_v14  ;;  %v2303_v14 = vld [vmem:[#allocation2 + $0x60] sm:$0xff] }
 0xa1e   :  { %v1074_v53 = vpop.permute.xlu1 %1073 }
 0xa1f   :  { %2153 = vtanh.f32 %v1077_v41  ;;  %v1078_v32 = vadd.f32 %v1074_v53, %v978_v19 }
 0xa21   :  { %2155 = vtanh.f32 %v1078_v32  ;;  %v2301_v32 = vld [vmem:[#allocation2 + $0x80] sm:$0xff] }
 0xa22   :  { %2157 = vpow2.f32 %v1906_v56 }
 0xa23   :  { %2159 = vpow2.f32 %v1907_v27  ;;  %v2304_v27 = vld [vmem:[#allocation2 + $0x70] sm:$0xff] }
 0xa25   :  { %v2150_v58 = vpop.eup %2149 }
 0xa26   :  { %1019 = vrot.lane.b32.xlu0 %v2150_v58, %s2320_s4 }
 0xa27   :  { %v2152_v52 = vpop.eup %2151 }
 0xa28   :  { %1021 = vrot.lane.b32.xlu1 %v2152_v52, %s2320_s4  ;;  %v2302_v52 = vld [vmem:[#allocation2 + $0x90] sm:$0xff] }
 0xa29   :  { %v2154_v3 = vpop.eup %2153 }
 0xa2a   :  { %1085 = vrot.lane.b32.xlu0 %v2154_v3, %s2320_s4 }
 0xa2b   :  { %v2156_v35 = vpop.eup %2155 }
 0xa2c   :  { %1087 = vrot.lane.b32.xlu1 %v2156_v35, %s2320_s4  ;;  %v2158_v25 = vpop.eup %2157 }
 0xa2d   :  { %v2160_v15 = vpop.eup %2159  ;;  %v1053_v61 = vadd.f32 1.0, %v2158_v25 }
 0xa2e   :  { %v1054_v16 = vadd.f32 1.0, %v2160_v15 }
 0xa2f   :  { %2161 = vrcp.f32 %v1053_v61 }
 0xa30   :  { %2163 = vrcp.f32 %v1054_v16 }
 0xa39   :  { %v2162_v21 = vpop.eup %2161 }
 0xa3a   :  { %v2164_v24 = vpop.eup %2163  ;;  %v1081_v11 = vsub.f32 1.0, %v2162_v21  ;;  %v1093_v10 = vmul.f32 %v2162_v21, %v2741_v26 }
 0xa3b   :  { %v1082_v8 = vsub.f32 1.0, %v2164_v24  ;;  %v1094_v31 = vmul.f32 %v2164_v24, %v2743_v60 }
 0xa98   :  { %v1020_v23 = vpop.permute.xlu0 %1019 }
 0xa99   :  { %v1025_v4 = vmul.f32 %v1020_v23, %v1015_v20 }
 0xa9a   :  { %v1022_v6 = vpop.permute.xlu1 %1021 }
 0xa9b   :  { %v1026_v2 = vmul.f32 %v1022_v6, %v1016_v44  ;;  %v2830_v13 = vadd.f32 %v1027_v57, %v1025_v4 }
 0xa9c   :  { %v1086_v12 = vpop.permute.xlu0 %1085 }
 0xa9d   :  { %v2832_v51 = vadd.f32 %v1028_v28, %v1026_v2  ;;  %v1091_v42 = vmul.f32 %v1086_v12, %v1081_v11 }
 0xa9e   :  { %v1088_v22 = vpop.permute.xlu1 %1087 }
 0xa9f   :  { %v1092_v46 = vmul.f32 %v1088_v22, %v1082_v8  ;;  %v1971_v54 = vpack.i.bf16 %v2832_v51, %v2830_v13  ;;  %v2838_v18 = vadd.f32 %v1093_v10, %v1091_v42 }
 0xaa1   :  { %v2840_v55 = vadd.f32 %v1094_v31, %v1092_v46  ;;  %1972 = vrot.lane.b32.xlu0 %v1971_v54, %s2320_s4 }
 0xaa3   :  { %v1976_v29 = vpack.i.bf16 %v2840_v55, %v2838_v18 }
 0xaa5   :  { %1977 = vrot.lane.b32.xlu1 %v1976_v29, %s2321_s10 }
 0xb13   :  { %v1973_v34 = vpop.permute.xlu0 %1972 }
 0xb14   :  { %v1975_v26 = vunpack.i.h.bf16 %v1973_v34  ;;  %v1974_v43 = vunpack.i.l.bf16 %v1973_v34 }
 0xb17   :  { %v1978_v36 = vpop.permute.xlu1 %1977 }
 0xb18   :  { %v1980_v60 = vunpack.i.h.bf16 %v1978_v36  ;;  %v1979_v45 = vunpack.i.l.bf16 %v1978_v36 }
 0xb1a   :  { %v1113_v48 = vsel %vm113_vm0, %v1974_v43, %v1979_v45  ;;  %v1114_v33 = vsel %vm113_vm0, %v1975_v26, %v1980_v60  ;;  %v971_v43 = vld [vmem:[#allocation2 + $0x68] sm:$0xff] }
 0xb1b   :  { %v1115_v59 = vpack.c.bf16 %v1114_v33, %v1113_v48  ;;  %v973_v48 = vld [vmem:[#allocation2 + $0x78] sm:$0xff] }
 0xb1d   :  { %1908 = vmatmul.mubr.msk.bf16.vlgmr.msra.gmra.mrb[32].mxu0 %vm252_vm1, %v1115_v59 }
 0xb1e   :  { %1486 = vmatpush1.bf16.msra.mxu0 %v2755_v62  ;;  %1517 = vmatprep.mubr.bf16.mxu0 %v2317_v1 }
 0xb1f   :  { %1487 = vmatprep.subr.bf16.mxu0 %v2762_v63 }
 0xb22   :  { %1488 = vmatpush1.bf16.msra.mxu0 %v2768_v0 }
 0xb23   :  { %1489 = vmatprep.subr.bf16.mxu0 %v2774_v5 }
 0xb26   :  { %1490 = vmatpush1.bf16.msra.mxu0 %v2780_v7 }
 0xb27   :  { %1491 = vmatprep.subr.bf16.mxu0 %v2786_v30 }
 0xb2a   :  { %1492 = vmatpush1.bf16.msra.mxu0 %v2792_v37 }
 0xbf0   :  { %v1153_v49 = vpop.f32.mrb[32].mxu0 }
 0xbf1   :  { %v1154_v47 = vadd.f32 %v1153_v49, %v2494_v38  ;;  %v1155_v50 = vpop.f32.mrb[33].mxu0 }
 0xbf2   :  { %v1157_v40 = vpop.f32.mrb[34].mxu0  ;;  %v2861_v19 = vadd.f32 %v1155_v50, %v2496_v39 }
 0xbf3   :  { %v1158_v17 = vadd.f32 %v1157_v40, %v2494_v38  ;;  %v1159_v41 = vpop.f32.mrb[35].mxu0  ;;  %1178 = vrot.lane.b32.xlu0 %v1154_v47, %s2319_s3  ;;  %v1162_v58 = vadd.f32 %v2301_v32, %v1154_v47  ;;  %v1214_v9 = vadd.f32 %v2303_v14, %v1154_v47 }
 0xbf4   :  { %v2865_v53 = vadd.f32 %v1159_v41, %v2496_v39 }
 0xbf5   :  { %1180 = vrot.lane.b32.xlu1 %v1158_v17, %s2319_s3  ;;  %v1163_v3 = vadd.f32 %v2302_v52, %v1158_v17  ;;  %v1909_v35 = vmul.f32 -1.442695, %v1162_v58  ;;  %v1215_v25 = vadd.f32 %v2304_v27, %v1158_v17  ;;  %v1911_v15 = vmul.f32 -1.442695, %v1214_v9 }
 0xbf6   :  { %v1228_v17 = vadd.f32 %v2861_v19, %v971_v43  ;;  %v1229_v41 = vadd.f32 %v2865_v53, %v973_v48 }
 0xbf7   :  { %1244 = vrot.lane.b32.xlu0 %v2861_v19, %s2319_s3  ;;  %v1910_v56 = vmul.f32 -1.442695, %v1163_v3  ;;  %2165 = vpow2.f32 %v1909_v35  ;;  %v1912_v61 = vmul.f32 -1.442695, %v1215_v25 }
 0xbf8   :  { %v1914_v58 = vmul.f32 -1.442695, %v1229_v41 }
 0xbf9   :  { %1246 = vrot.lane.b32.xlu1 %v2865_v53, %s2319_s3  ;;  %2167 = vpow2.f32 %v1910_v56 }
 0xbfa   :  { %2169 = vpow2.f32 %v1911_v15 }
 0xbfb   :  { %2171 = vpow2.f32 %v1912_v61 }
 0xc01   :  { %v2166_v16 = vpop.eup %2165 }
 0xc02   :  { %v1170_v21 = vadd.f32 1.0, %v2166_v16 }
 0xc03   :  { %v2168_v20 = vpop.eup %2167 }
 0xc04   :  { %v2170_v23 = vpop.eup %2169  ;;  %v1171_v4 = vadd.f32 1.0, %v2168_v20  ;;  %2173 = vrcp.f32 %v1170_v21 }
 0xc05   :  { %v2172_v44 = vpop.eup %2171  ;;  %v1222_v24 = vadd.f32 1.0, %v2170_v23 }
 0xc06   :  { %2175 = vrcp.f32 %v1171_v4  ;;  %v1223_v6 = vadd.f32 1.0, %v2172_v44 }
 0xc07   :  { %2177 = vrcp.f32 %v1222_v24 }
 0xc08   :  { %2179 = vrcp.f32 %v1223_v6 }
 0xc0e   :  { %v2174_v57 = vpop.eup %2173 }
 0xc0f   :  { %v1198_v9 = vsub.f32 1.0, %v2174_v57  ;;  %v1210_v19 = vmul.f32 %v2174_v57, %v2830_v13 }
 0xc10   :  { %v2176_v11 = vpop.eup %2175 }
 0xc11   :  { %v2178_v8 = vpop.eup %2177  ;;  %v1199_v15 = vsub.f32 1.0, %v2176_v11  ;;  %v1211_v53 = vmul.f32 %v2176_v11, %v2832_v51 }
 0xc12   :  { %v2180_v31 = vpop.eup %2179 }
 0xc65   :  { %v1179_v28 = vpop.permute.xlu0 %1178 }
 0xc66   :  { %v1184_v2 = vmul.f32 %v2174_v57, %v1179_v28 }
 0xc67   :  { %v1181_v12 = vpop.permute.xlu1 %1180 }
 0xc68   :  { %v1185_v42 = vmul.f32 %v2176_v11, %v1181_v12  ;;  %1188 = vrot.lane.b32.xlu0 %v1184_v2, %s2319_s3 }
 0xc69   :  { %v1245_v22 = vpop.permute.xlu0 %1244 }
 0xc6a   :  { %v1250_v10 = vmul.f32 %v2178_v8, %v1245_v22  ;;  %1190 = vrot.lane.b32.xlu1 %v1185_v42, %s2319_s3 }
 0xc6b   :  { %v1247_v46 = vpop.permute.xlu1 %1246 }
 0xc6c   :  { %v1251_v54 = vmul.f32 %v2180_v31, %v1247_v46  ;;  %1254 = vrot.lane.b32.xlu0 %v1250_v10, %s2319_s3 }
 0xc6e   :  { %1256 = vrot.lane.b32.xlu1 %v1251_v54, %s2319_s3 }
 0xcda   :  { %v1189_v29 = vpop.permute.xlu0 %1188 }
 0xcdb   :  { %v1194_v34 = vadd.f32 %v2301_v32, %v1189_v29  ;;  %v1913_v32 = vmul.f32 -1.442695, %v1228_v17 }
 0xcdc   :  { %v1191_v36 = vpop.permute.xlu1 %1190 }
 0xcdd   :  { %2181 = vtanh.f32 %v1194_v34  ;;  %v1195_v26 = vadd.f32 %v2302_v52, %v1191_v36 }
 0xcde   :  { %v1255_v60 = vpop.permute.xlu0 %1254 }
 0xcdf   :  { %2183 = vtanh.f32 %v1195_v26  ;;  %v1260_v45 = vadd.f32 %v1255_v60, %v971_v43 }
 0xce0   :  { %v1257_v33 = vpop.permute.xlu1 %1256 }
 0xce1   :  { %2185 = vtanh.f32 %v1260_v45  ;;  %v1261_v59 = vadd.f32 %v1257_v33, %v973_v48  ;;  %v2307_v45 = vld [vmem:[#allocation2 + $0x40] sm:$0xff] }
 0xce3   :  { %2187 = vtanh.f32 %v1261_v59  ;;  %v2308_v59 = vld [vmem:[#allocation2 + $0x50] sm:$0xff] }
 0xce4   :  { %2189 = vpow2.f32 %v1913_v32 }
 0xce5   :  { %2191 = vpow2.f32 %v1914_v58 }
 0xce7   :  { %v2182_v49 = vpop.eup %2181 }
 0xce8   :  { %1202 = vrot.lane.b32.xlu0 %v2182_v49, %s2320_s4 }
 0xce9   :  { %v2184_v47 = vpop.eup %2183 }
 0xcea   :  { %1204 = vrot.lane.b32.xlu1 %v2184_v47, %s2320_s4 }
 0xceb   :  { %v2186_v50 = vpop.eup %2185 }
 0xcec   :  { %1268 = vrot.lane.b32.xlu0 %v2186_v50, %s2320_s4 }
 0xced   :  { %v2188_v40 = vpop.eup %2187 }
 0xcee   :  { %1270 = vrot.lane.b32.xlu1 %v2188_v40, %s2320_s4  ;;  %v2190_v52 = vpop.eup %2189 }
 0xcef   :  { %v2192_v3 = vpop.eup %2191  ;;  %v1236_v35 = vadd.f32 1.0, %v2190_v52 }
 0xcf0   :  { %v1237_v14 = vadd.f32 1.0, %v2192_v3 }
 0xcf1   :  { %2193 = vrcp.f32 %v1236_v35 }
 0xcf2   :  { %2195 = vrcp.f32 %v1237_v14 }
 0xcfb   :  { %v2194_v56 = vpop.eup %2193 }
 0xcfc   :  { %v2196_v61 = vpop.eup %2195  ;;  %v1264_v21 = vsub.f32 1.0, %v2194_v56  ;;  %v1276_v2 = vmul.f32 %v2194_v56, %v2838_v18 }
 0xcfd   :  { %v1265_v6 = vsub.f32 1.0, %v2196_v61  ;;  %v1277_v12 = vmul.f32 %v2196_v61, %v2840_v55 }
 0xd5a   :  { %v1203_v27 = vpop.permute.xlu0 %1202 }
 0xd5b   :  { %v1208_v25 = vmul.f32 %v1203_v27, %v1198_v9 }
 0xd5c   :  { %v1205_v16 = vpop.permute.xlu1 %1204 }
 0xd5d   :  { %v1209_v20 = vmul.f32 %v1205_v16, %v1199_v15  ;;  %v2883_v4 = vadd.f32 %v1210_v19, %v1208_v25 }
 0xd5e   :  { %v1269_v23 = vpop.permute.xlu0 %1268 }
 0xd5f   :  { %v2885_v44 = vadd.f32 %v1211_v53, %v1209_v20  ;;  %v1274_v24 = vmul.f32 %v1269_v23, %v1264_v21 }
 0xd60   :  { %v1271_v28 = vpop.permute.xlu1 %1270 }
 0xd61   :  { %v1275_v42 = vmul.f32 %v1271_v28, %v1265_v6  ;;  %v1981_v13 = vpack.i.bf16 %v2885_v44, %v2883_v4  ;;  %v2891_v57 = vadd.f32 %v1276_v2, %v1274_v24  ;;  %v778_v2 = vld [vmem:[#allocation2 + $0x48] sm:$0xff] }
 0xd63   :  { %v2893_v51 = vadd.f32 %v1277_v12, %v1275_v42  ;;  %1982 = vrot.lane.b32.xlu0 %v1981_v13, %s2320_s4  ;;  %v780_v13 = vld [vmem:[#allocation2 + $0x58] sm:$0xff] }
 0xd65   :  { %v1986_v11 = vpack.i.bf16 %v2893_v51, %v2891_v57 }
 0xd67   :  { %1987 = vrot.lane.b32.xlu1 %v1986_v11, %s2321_s10 }
 0xdd5   :  { %v1983_v8 = vpop.permute.xlu0 %1982 }
 0xdd6   :  { %v1985_v18 = vunpack.i.h.bf16 %v1983_v8  ;;  %v1984_v10 = vunpack.i.l.bf16 %v1983_v8 }
 0xdd9   :  { %v1988_v22 = vpop.permute.xlu1 %1987 }
 0xdda   :  { %v1990_v55 = vunpack.i.h.bf16 %v1988_v22  ;;  %v1989_v31 = vunpack.i.l.bf16 %v1988_v22 }
 0xddc   :  { %v1296_v46 = vsel %vm113_vm0, %v1984_v10, %v1989_v31  ;;  %v1297_v54 = vsel %vm113_vm0, %v1985_v18, %v1990_v55 }
 0xddd   :  { %v1298_v29 = vpack.c.bf16 %v1297_v54, %v1296_v46 }
 0xddf   :  { %1915 = vmatmul.mubr.msk.bf16.vlgmr.msra.gmra.mrb[16].mxu1 %vm252_vm1, %v1298_v29 }
 0xde0   :  { %1669 = vmatpush1.bf16.msra.mxu1 %v2755_v62  ;;  %1700 = vmatprep.mubr.bf16.mxu1 %v2317_v1 }
 0xde1   :  { %1670 = vmatprep.subr.bf16.mxu1 %v2762_v63 }
 0xde4   :  { %1671 = vmatpush1.bf16.msra.mxu1 %v2768_v0 }
 0xde5   :  { %1672 = vmatprep.subr.bf16.mxu1 %v2774_v5  ;;  %v2305_v5 = vld [vmem:[#allocation2 + $0xa0] sm:$0xff] }
 0xde8   :  { %1673 = vmatpush1.bf16.msra.mxu1 %v2780_v7 }
 0xde9   :  { %1674 = vmatprep.subr.bf16.mxu1 %v2786_v30  ;;  %v2306_v30 = vld [vmem:[#allocation2 + $0xb0] sm:$0xff] }
 0xdec   :  { %1675 = vmatpush1.bf16.msra.mxu1 %v2792_v37 }
 0xeb2   :  { %v1336_v34 = vpop.f32.mrb[16].mxu1 }
 0xeb3   :  { %v1337_v36 = vadd.f32 %v1336_v34, %v2494_v38  ;;  %v1338_v26 = vpop.f32.mrb[17].mxu1 }
 0xeb4   :  { %v1340_v43 = vpop.f32.mrb[18].mxu1  ;;  %v2914_v63 = vadd.f32 %v1338_v26, %v2496_v39 }
 0xeb5   :  { %v1341_v62 = vadd.f32 %v1340_v43, %v2494_v38  ;;  %v1342_v1 = vpop.f32.mrb[19].mxu1  ;;  %1361 = vrot.lane.b32.xlu0 %v1337_v36, %s2319_s3  ;;  %v1345_v7 = vadd.f32 %v2305_v5, %v1337_v36  ;;  %v1397_v48 = vadd.f32 %v2307_v45, %v1337_v36 }
 0xeb6   :  { %v2918_v0 = vadd.f32 %v1342_v1, %v2496_v39  ;;  %v1411_v31 = vadd.f32 %v2914_v63, %v778_v2 }
 0xeb7   :  { %1363 = vrot.lane.b32.xlu1 %v1341_v62, %s2319_s3  ;;  %v1346_v37 = vadd.f32 %v2306_v30, %v1341_v62  ;;  %v1916_v60 = vmul.f32 -1.442695, %v1345_v7  ;;  %v1398_v49 = vadd.f32 %v2308_v59, %v1341_v62  ;;  %v1918_v47 = vmul.f32 -1.442695, %v1397_v48 }
 0xeb8   :  { %v1412_v46 = vadd.f32 %v2918_v0, %v780_v13  ;;  %v1920_v54 = vmul.f32 -1.442695, %v1411_v31 }
 0xeb9   :  { %1427 = vrot.lane.b32.xlu0 %v2914_v63, %s2319_s3  ;;  %v1917_v33 = vmul.f32 -1.442695, %v1346_v37  ;;  %2197 = vpow2.f32 %v1916_v60  ;;  %v1919_v50 = vmul.f32 -1.442695, %v1398_v49 }
 0xeba   :  { %v1921_v29 = vmul.f32 -1.442695, %v1412_v46 }
 0xebb   :  { %1429 = vrot.lane.b32.xlu1 %v2918_v0, %s2319_s3  ;;  %2199 = vpow2.f32 %v1917_v33 }
 0xebc   :  { %2201 = vpow2.f32 %v1918_v47 }
 0xebd   :  { %2203 = vpow2.f32 %v1919_v50 }
 0xec3   :  { %v2198_v40 = vpop.eup %2197 }
 0xec4   :  { %v1353_v41 = vadd.f32 1.0, %v2198_v40 }
 0xec5   :  { %v2200_v17 = vpop.eup %2199 }
 0xec6   :  { %v2202_v32 = vpop.eup %2201  ;;  %v1354_v58 = vadd.f32 1.0, %v2200_v17  ;;  %2205 = vrcp.f32 %v1353_v41 }
 0xec7   :  { %v2204_v52 = vpop.eup %2203  ;;  %v1405_v3 = vadd.f32 1.0, %v2202_v32 }
 0xec8   :  { %2207 = vrcp.f32 %v1354_v58  ;;  %v1406_v35 = vadd.f32 1.0, %v2204_v52 }
 0xec9   :  { %2209 = vrcp.f32 %v1405_v3 }
 0xeca   :  { %2211 = vrcp.f32 %v1406_v35 }
 0xed0   :  { %v2206_v14 = vpop.eup %2205 }
 0xed1   :  { %v1381_v62 = vsub.f32 1.0, %v2206_v14  ;;  %v1393_v63 = vmul.f32 %v2206_v14, %v2883_v4 }
 0xed2   :  { %v2208_v27 = vpop.eup %2207 }
 0xed3   :  { %v2210_v61 = vpop.eup %2209  ;;  %v1394_v0 = vmul.f32 %v2208_v27, %v2885_v44 }
 0xed4   :  { %v2212_v53 = vpop.eup %2211 }
 0xf27   :  { %v1362_v9 = vpop.permute.xlu0 %1361 }
 0xf28   :  { %v1367_v56 = vmul.f32 %v2206_v14, %v1362_v9 }
 0xf29   :  { %v1364_v25 = vpop.permute.xlu1 %1363 }
 0xf2a   :  { %v1368_v15 = vmul.f32 %v2208_v27, %v1364_v25  ;;  %1371 = vrot.lane.b32.xlu0 %v1367_v56, %s2319_s3 }
 0xf2b   :  { %v1428_v16 = vpop.permute.xlu0 %1427 }
 0xf2c   :  { %v1433_v19 = vmul.f32 %v2210_v61, %v1428_v16  ;;  %1373 = vrot.lane.b32.xlu1 %v1368_v15, %s2319_s3 }
 0xf2d   :  { %v1430_v20 = vpop.permute.xlu1 %1429 }
 0xf2e   :  { %v1434_v21 = vmul.f32 %v2212_v53, %v1430_v20  ;;  %1437 = vrot.lane.b32.xlu0 %v1433_v19, %s2319_s3 }
 0xf30   :  { %1439 = vrot.lane.b32.xlu1 %v1434_v21, %s2319_s3 }
 0xf9c   :  { %v1372_v23 = vpop.permute.xlu0 %1371 }
 0xf9d   :  { %v1377_v24 = vadd.f32 %v2305_v5, %v1372_v23 }
 0xf9e   :  { %v1374_v6 = vpop.permute.xlu1 %1373 }
 0xf9f   :  { %2213 = vtanh.f32 %v1377_v24  ;;  %v1378_v28 = vadd.f32 %v2306_v30, %v1374_v6  ;;  %v1382_v30 = vsub.f32 1.0, %v2208_v27  ;;  %v2309_v24 = vld [vmem:[#allocation2 + $0xc0] sm:$0xff] }
 0xfa0   :  { %v1438_v12 = vpop.permute.xlu0 %1437 }
 0xfa1   :  { %2215 = vtanh.f32 %v1378_v28  ;;  %v1443_v42 = vadd.f32 %v1438_v12, %v778_v2  ;;  %v2310_v28 = vld [vmem:[#allocation2 + $0xd0] sm:$0xff] }
 0xfa2   :  { %v1440_v11 = vpop.permute.xlu1 %1439 }
 0xfa3   :  { %2217 = vtanh.f32 %v1443_v42  ;;  %v1444_v8 = vadd.f32 %v1440_v11, %v780_v13  ;;  %v2311_v42 = vld [vmem:[#allocation2 + $0x20] sm:$0xff] }
 0xfa5   :  { %2219 = vtanh.f32 %v1444_v8  ;;  %v2312_v8 = vld [vmem:[#allocation2 + $0x30] sm:$0xff] }
 0xfa6   :  { %2221 = vpow2.f32 %v1920_v54 }
 0xfa7   :  { %2223 = vpow2.f32 %v1921_v29 }
 0xfa9   :  { %v2214_v22 = vpop.eup %2213 }
 0xfaa   :  { %1385 = vrot.lane.b32.xlu0 %v2214_v22, %s2320_s4 }
 0xfab   :  { %v2216_v18 = vpop.eup %2215 }
 0xfac   :  { %1387 = vrot.lane.b32.xlu1 %v2216_v18, %s2320_s4 }
 0xfad   :  { %v2218_v10 = vpop.eup %2217 }
 0xfae   :  { %1451 = vrot.lane.b32.xlu0 %v2218_v10, %s2320_s4 }
 0xfaf   :  { %v2220_v55 = vpop.eup %2219 }
 0xfb0   :  { %1453 = vrot.lane.b32.xlu1 %v2220_v55, %s2320_s4  ;;  %v2222_v34 = vpop.eup %2221 }
 0xfb1   :  { %v2224_v36 = vpop.eup %2223  ;;  %v1419_v26 = vadd.f32 1.0, %v2222_v34 }
 0xfb2   :  { %v1420_v43 = vadd.f32 1.0, %v2224_v36 }
 0xfb3   :  { %2225 = vrcp.f32 %v1419_v26 }
 0xfb4   :  { %2227 = vrcp.f32 %v1420_v43 }
 0xfbd   :  { %v2226_v1 = vpop.eup %2225 }
 0xfbe   :  { %v2228_v37 = vpop.eup %2227  ;;  %v1447_v48 = vsub.f32 1.0, %v2226_v1  ;;  %v1459_v17 = vmul.f32 %v2226_v1, %v2891_v57 }
 0xfbf   :  { %v1448_v50 = vsub.f32 1.0, %v2228_v37  ;;  %v1460_v41 = vmul.f32 %v2228_v37, %v2893_v51 }
0x101c   :  { %v1386_v5 = vpop.permute.xlu0 %1385 }
0x101d   :  { %v1391_v7 = vmul.f32 %v1386_v5, %v1381_v62 }
0x101e   :  { %v1388_v60 = vpop.permute.xlu1 %1387 }
0x101f   :  { %v1392_v45 = vmul.f32 %v1388_v60, %v1382_v30  ;;  %v2936_v59 = vadd.f32 %v1393_v63, %v1391_v7 }
0x1020   :  { %v1452_v33 = vpop.permute.xlu0 %1451 }
0x1021   :  { %v2938_v49 = vadd.f32 %v1394_v0, %v1392_v45  ;;  %v1457_v47 = vmul.f32 %v1452_v33, %v1447_v48 }
0x1022   :  { %v1454_v40 = vpop.permute.xlu1 %1453 }
0x1023   :  { %v1458_v32 = vmul.f32 %v1454_v40, %v1448_v50  ;;  %v1991_v4 = vpack.i.bf16 %v2938_v49, %v2936_v59  ;;  %v2944_v58 = vadd.f32 %v1459_v17, %v1457_v47  ;;  %v585_v17 = vld [vmem:[#allocation2 + $0x28] sm:$0xff] }
0x1025   :  { %v2946_v44 = vadd.f32 %v1460_v41, %v1458_v32  ;;  %1992 = vrot.lane.b32.xlu0 %v1991_v4, %s2320_s4  ;;  %v587_v4 = vld [vmem:[#allocation2 + $0x38] sm:$0xff] }
0x1027   :  { %v1996_v52 = vpack.i.bf16 %v2946_v44, %v2944_v58 }
0x1029   :  { %1997 = vrot.lane.b32.xlu1 %v1996_v52, %s2321_s10 }
0x1097   :  { %v1993_v3 = vpop.permute.xlu0 %1992 }
0x1098   :  { %v1995_v57 = vunpack.i.h.bf16 %v1993_v3  ;;  %v1994_v14 = vunpack.i.l.bf16 %v1993_v3 }
0x109b   :  { %v1998_v35 = vpop.permute.xlu1 %1997 }
0x109c   :  { %v2000_v51 = vunpack.i.h.bf16 %v1998_v35  ;;  %v1999_v9 = vunpack.i.l.bf16 %v1998_v35 }
0x109e   :  { %v1479_v56 = vsel %vm113_vm0, %v1994_v14, %v1999_v9  ;;  %v1480_v27 = vsel %vm113_vm0, %v1995_v57, %v2000_v51 }
0x109f   :  { %v1481_v25 = vpack.c.bf16 %v1480_v27, %v1479_v56 }
0x10a1   :  { %1922 = vmatmul.mubr.msk.bf16.vlgmr.msra.gmra.mrb[36].mxu0 %vm252_vm1, %v1481_v25 }
0x1174   :  { %v1519_v15 = vpop.f32.mrb[36].mxu0 }
0x1175   :  { %v1520_v61 = vadd.f32 %v1519_v15, %v2494_v38  ;;  %v1521_v16 = vpop.f32.mrb[37].mxu0 }
0x1176   :  { %v1523_v19 = vpop.f32.mrb[38].mxu0  ;;  %v2959_v21 = vadd.f32 %v1521_v16, %v2496_v39 }
0x1177   :  { %v1524_v53 = vadd.f32 %v1523_v19, %v2494_v38  ;;  %v1525_v20 = vpop.f32.mrb[39].mxu0  ;;  %1544 = vrot.lane.b32.xlu0 %v1520_v61, %s2319_s3  ;;  %v1528_v6 = vadd.f32 %v2309_v24, %v1520_v61  ;;  %v1580_v13 = vadd.f32 %v2311_v42, %v1520_v61 }
0x1178   :  { %v2963_v23 = vadd.f32 %v1525_v20, %v2496_v39  ;;  %v1594_v9 = vadd.f32 %v2959_v21, %v585_v17 }
0x1179   :  { %1546 = vrot.lane.b32.xlu1 %v1524_v53, %s2319_s3  ;;  %v1529_v2 = vadd.f32 %v2310_v28, %v1524_v53  ;;  %v1923_v12 = vmul.f32 -1.442695, %v1528_v6  ;;  %v1581_v22 = vadd.f32 %v2312_v8, %v1524_v53  ;;  %v1925_v18 = vmul.f32 -1.442695, %v1580_v13 }
0x117a   :  { %v1595_v56 = vadd.f32 %v2963_v23, %v587_v4  ;;  %v1927_v27 = vmul.f32 -1.442695, %v1594_v9 }
0x117b   :  { %1610 = vrot.lane.b32.xlu0 %v2959_v21, %s2319_s3  ;;  %v1924_v11 = vmul.f32 -1.442695, %v1529_v2  ;;  %2229 = vpow2.f32 %v1923_v12  ;;  %v1926_v10 = vmul.f32 -1.442695, %v1581_v22 }
0x117c   :  { %v1928_v25 = vmul.f32 -1.442695, %v1595_v56 }
0x117d   :  { %1612 = vrot.lane.b32.xlu1 %v2963_v23, %s2319_s3  ;;  %2231 = vpow2.f32 %v1924_v11 }
0x117e   :  { %2233 = vpow2.f32 %v1925_v18 }
0x117f   :  { %2235 = vpow2.f32 %v1926_v10 }
0x1185   :  { %v2230_v55 = vpop.eup %2229 }
0x1186   :  { %v1536_v46 = vadd.f32 1.0, %v2230_v55 }
0x1187   :  { %v2232_v31 = vpop.eup %2231 }
0x1188   :  { %v2234_v54 = vpop.eup %2233  ;;  %v1537_v29 = vadd.f32 1.0, %v2232_v31  ;;  %2237 = vrcp.f32 %v1536_v46 }
0x1189   :  { %v2236_v34 = vpop.eup %2235  ;;  %v1588_v36 = vadd.f32 1.0, %v2234_v54 }
0x118a   :  { %2239 = vrcp.f32 %v1537_v29  ;;  %v1589_v26 = vadd.f32 1.0, %v2236_v34 }
0x118b   :  { %2241 = vrcp.f32 %v1588_v36 }
0x118c   :  { %2243 = vrcp.f32 %v1589_v26 }
0x1192   :  { %v2238_v43 = vpop.eup %2237 }
0x1193   :  { %v1564_v53 = vsub.f32 1.0, %v2238_v43  ;;  %v1576_v21 = vmul.f32 %v2238_v43, %v2936_v59 }
0x1194   :  { %v2240_v5 = vpop.eup %2239 }
0x1195   :  { %v2242_v37 = vpop.eup %2241  ;;  %v1577_v23 = vmul.f32 %v2240_v5, %v2938_v49 }
0x1196   :  { %v2244_v0 = vpop.eup %2243 }
0x11e9   :  { %v1545_v62 = vpop.permute.xlu0 %1544 }
0x11ea   :  { %v1550_v1 = vmul.f32 %v2238_v43, %v1545_v62 }
0x11eb   :  { %v1547_v7 = vpop.permute.xlu1 %1546 }
0x11ec   :  { %v1551_v30 = vmul.f32 %v2240_v5, %v1547_v7  ;;  %1554 = vrot.lane.b32.xlu0 %v1550_v1, %s2319_s3 }
0x11ed   :  { %v1611_v60 = vpop.permute.xlu0 %1610 }
0x11ee   :  { %v1616_v63 = vmul.f32 %v2242_v37, %v1611_v60  ;;  %1556 = vrot.lane.b32.xlu1 %v1551_v30, %s2319_s3 }
0x11ef   :  { %v1613_v45 = vpop.permute.xlu1 %1612 }
0x11f0   :  { %v1617_v48 = vmul.f32 %v2244_v0, %v1613_v45  ;;  %1620 = vrot.lane.b32.xlu0 %v1616_v63, %s2319_s3 }
0x11f2   :  { %1622 = vrot.lane.b32.xlu1 %v1617_v48, %s2319_s3 }
0x125e   :  { %v1555_v33 = vpop.permute.xlu0 %1554 }
0x125f   :  { %v1560_v47 = vadd.f32 %v2309_v24, %v1555_v33 }
0x1260   :  { %v1557_v50 = vpop.permute.xlu1 %1556 }
0x1261   :  { %2245 = vtanh.f32 %v1560_v47  ;;  %v1561_v40 = vadd.f32 %v2310_v28, %v1557_v50  ;;  %v1565_v28 = vsub.f32 1.0, %v2240_v5  ;;  %v2313_v47 = vld [vmem:[#allocation2] sm:$0xff] }
0x1262   :  { %v1621_v41 = vpop.permute.xlu0 %1620 }
0x1263   :  { %2247 = vtanh.f32 %v1561_v40  ;;  %v1626_v32 = vadd.f32 %v1621_v41, %v585_v17  ;;  %v2314_v40 = vld [vmem:[#allocation2 + $0x10] sm:$0xff] }
0x1264   :  { %v1623_v52 = vpop.permute.xlu1 %1622 }
0x1265   :  { %2249 = vtanh.f32 %v1626_v32  ;;  %v1627_v3 = vadd.f32 %v1623_v52, %v587_v4  ;;  %v2316_v4 = vld [vmem:[#allocation2 + $0xf0] sm:$0xff] }
0x1267   :  { %2251 = vtanh.f32 %v1627_v3 }
0x1268   :  { %2253 = vpow2.f32 %v1927_v27 }
0x1269   :  { %2255 = vpow2.f32 %v1928_v25 }
0x126b   :  { %v2246_v35 = vpop.eup %2245 }
0x126c   :  { %1568 = vrot.lane.b32.xlu0 %v2246_v35, %s2320_s4 }
0x126d   :  { %v2248_v57 = vpop.eup %2247 }
0x126e   :  { %1570 = vrot.lane.b32.xlu1 %v2248_v57, %s2320_s4 }
0x126f   :  { %v2250_v14 = vpop.eup %2249 }
0x1270   :  { %1634 = vrot.lane.b32.xlu0 %v2250_v14, %s2320_s4 }
0x1271   :  { %v2252_v51 = vpop.eup %2251 }
0x1272   :  { %1636 = vrot.lane.b32.xlu1 %v2252_v51, %s2320_s4  ;;  %v2254_v15 = vpop.eup %2253 }
0x1273   :  { %v2256_v61 = vpop.eup %2255  ;;  %v1602_v16 = vadd.f32 1.0, %v2254_v15 }
0x1274   :  { %v1603_v19 = vadd.f32 1.0, %v2256_v61 }
0x1275   :  { %2257 = vrcp.f32 %v1602_v16 }
0x1276   :  { %2259 = vrcp.f32 %v1603_v19 }
0x127f   :  { %v2258_v20 = vpop.eup %2257 }
0x1280   :  { %v2260_v2 = vpop.eup %2259  ;;  %v1630_v13 = vsub.f32 1.0, %v2258_v20  ;;  %v1642_v31 = vmul.f32 %v2258_v20, %v2944_v58 }
0x1281   :  { %v1631_v10 = vsub.f32 1.0, %v2260_v2  ;;  %v1643_v46 = vmul.f32 %v2260_v2, %v2946_v44 }
0x12de   :  { %v1569_v24 = vpop.permute.xlu0 %1568 }
0x12df   :  { %v1574_v6 = vmul.f32 %v1569_v24, %v1564_v53 }
0x12e0   :  { %v1571_v12 = vpop.permute.xlu1 %1570 }
0x12e1   :  { %v1575_v42 = vmul.f32 %v1571_v12, %v1565_v28  ;;  %v2981_v8 = vadd.f32 %v1576_v21, %v1574_v6 }
0x12e2   :  { %v1635_v11 = vpop.permute.xlu0 %1634 }
0x12e3   :  { %v2983_v22 = vadd.f32 %v1577_v23, %v1575_v42  ;;  %v1640_v18 = vmul.f32 %v1635_v11, %v1630_v13  ;;  %v392_v42 = vld [vmem:[#allocation2 + $0x8] sm:$0xff] }
0x12e4   :  { %v1637_v55 = vpop.permute.xlu1 %1636 }
0x12e5   :  { %v1641_v54 = vmul.f32 %v1637_v55, %v1631_v10  ;;  %v2001_v59 = vpack.i.bf16 %v2983_v22, %v2981_v8  ;;  %v2989_v29 = vadd.f32 %v1642_v31, %v1640_v18  ;;  %v394_v18 = vld [vmem:[#allocation2 + $0x18] sm:$0xff] }
0x12e7   :  { %v2991_v49 = vadd.f32 %v1643_v46, %v1641_v54  ;;  %2002 = vrot.lane.b32.xlu0 %v2001_v59, %s2320_s4 }
0x12e9   :  { %v2006_v34 = vpack.i.bf16 %v2991_v49, %v2989_v29 }
0x12eb   :  { %2007 = vrot.lane.b32.xlu1 %v2006_v34, %s2321_s10 }
0x1359   :  { %v2003_v36 = vpop.permute.xlu0 %2002 }
0x135a   :  { %v2005_v58 = vunpack.i.h.bf16 %v2003_v36  ;;  %v2004_v43 = vunpack.i.l.bf16 %v2003_v36 }
0x135d   :  { %v2008_v26 = vpop.permute.xlu1 %2007 }
0x135e   :  { %v2010_v44 = vunpack.i.h.bf16 %v2008_v26  ;;  %v2009_v62 = vunpack.i.l.bf16 %v2008_v26 }
0x1360   :  { %v1662_v1 = vsel %vm113_vm0, %v2004_v43, %v2009_v62  ;;  %v1663_v5 = vsel %vm113_vm0, %v2005_v58, %v2010_v44 }
0x1361   :  { %v1664_v7 = vpack.c.bf16 %v1663_v5, %v1662_v1 }
0x1363   :  { %1929 = vmatmul.mubr.msk.bf16.vlgmr.msra.gmra.mrb[20].mxu1 %vm252_vm1, %v1664_v7 }
0x1436   :  { %v1702_v30 = vpop.f32.mrb[20].mxu1 }
0x1437   :  { %v1704_v37 = vpop.f32.mrb[21].mxu1  ;;  %v1703_v48 = vadd.f32 %v1702_v30, %v2494_v38 }
0x1438   :  { %v3001_v60 = vadd.f32 %v1704_v37, %v2496_v39  ;;  %v1706_v63 = vpop.f32.mrb[22].mxu1 }
0x1439   :  { %v1708_v0 = vpop.f32.mrb[23].mxu1  ;;  %v1707_v33 = vadd.f32 %v1706_v63, %v2494_v38  ;;  %v1763_v50 = vadd.f32 %v2313_v47, %v1703_v48 }
0x143a   :  { %v3004_v45 = vadd.f32 %v1708_v0, %v2496_v39  ;;  %1793 = vrot.lane.b32.xlu0 %v3001_v60, %s2319_s3  ;;  %v2315_v39 = vld [vmem:[#allocation2 + $0xe0] sm:$0xff]  ;;  %v1777_v43 = vadd.f32 %v3001_v60, %v392_v42 }
0x143b   :  { %v1764_v17 = vadd.f32 %v2314_v40, %v1707_v33  ;;  %v1711_v41 = vadd.f32 %v2315_v39, %v1703_v48  ;;  %v1932_v32 = vmul.f32 -1.442695, %v1763_v50  ;;  %v1712_v52 = vadd.f32 %v2316_v4, %v1707_v33 }
0x143c   :  { %1795 = vrot.lane.b32.xlu1 %v3004_v45, %s2319_s3  ;;  %v1778_v44 = vadd.f32 %v3004_v45, %v394_v18  ;;  %v1934_v62 = vmul.f32 -1.442695, %v1777_v43 }
0x143d   :  { %v1933_v3 = vmul.f32 -1.442695, %v1764_v17  ;;  %v1930_v35 = vmul.f32 -1.442695, %v1711_v41  ;;  %2261 = vpow2.f32 %v1932_v32  ;;  %v1931_v57 = vmul.f32 -1.442695, %v1712_v52 }
0x143e   :  { %1727 = vrot.lane.b32.xlu0 %v1703_v48, %s2319_s3  ;;  %v1935_v1 = vmul.f32 -1.442695, %v1778_v44 }
0x143f   :  { %2263 = vpow2.f32 %v1933_v3 }
0x1440   :  { %1729 = vrot.lane.b32.xlu1 %v1707_v33, %s2319_s3  ;;  %2265 = vpow2.f32 %v1930_v35 }
0x1441   :  { %2267 = vpow2.f32 %v1931_v57 }
0x1447   :  { %v2262_v38 = vpop.eup %2261 }
0x1448   :  { %v1771_v51 = vadd.f32 1.0, %v2262_v38 }
0x1449   :  { %v2264_v14 = vpop.eup %2263 }
0x144a   :  { %v2266_v9 = vpop.eup %2265  ;;  %v1772_v56 = vadd.f32 1.0, %v2264_v14  ;;  %2269 = vrcp.f32 %v1771_v51 }
0x144b   :  { %v2268_v27 = vpop.eup %2267  ;;  %v1719_v25 = vadd.f32 1.0, %v2266_v9 }
0x144c   :  { %v1720_v15 = vadd.f32 1.0, %v2268_v27  ;;  %2271 = vrcp.f32 %v1772_v56 }
0x144d   :  { %2273 = vrcp.f32 %v1719_v25 }
0x144e   :  { %2275 = vrcp.f32 %v1720_v15 }
0x1454   :  { %v2270_v61 = vpop.eup %2269 }
0x1456   :  { %v2272_v53 = vpop.eup %2271 }
0x1457   :  { %v3015_v6 = vpop.eup %2273 }
0x1458   :  { %v2276_v12 = vpop.eup %2275 }
0x1459   :  { %v1748_v35 = vsub.f32 1.0, %v2276_v12  ;;  %v1760_v14 = vmul.f32 %v2276_v12, %v2983_v22 }
0x14ac   :  { %v1794_v16 = vpop.permute.xlu0 %1793 }
0x14ad   :  { %v1799_v19 = vmul.f32 %v2270_v61, %v1794_v16 }
0x14ae   :  { %v1796_v20 = vpop.permute.xlu1 %1795 }
0x14af   :  { %v1800_v24 = vmul.f32 %v2272_v53, %v1796_v20  ;;  %1803 = vrot.lane.b32.xlu0 %v1799_v19, %s2319_s3 }
0x14b0   :  { %v1728_v28 = vpop.permute.xlu0 %1727 }
0x14b1   :  { %v1733_v2 = vmul.f32 %v3015_v6, %v1728_v28  ;;  %1805 = vrot.lane.b32.xlu1 %v1800_v24, %s2319_s3 }
0x14b2   :  { %v1730_v21 = vpop.permute.xlu1 %1729 }
0x14b3   :  { %v1734_v23 = vmul.f32 %v2276_v12, %v1730_v21  ;;  %1737 = vrot.lane.b32.xlu0 %v1733_v2, %s2319_s3 }
0x14b5   :  { %1739 = vrot.lane.b32.xlu1 %v1734_v23, %s2319_s3 }
0x1521   :  { %v1804_v13 = vpop.permute.xlu0 %1803 }
0x1522   :  { %v1809_v11 = vadd.f32 %v1804_v13, %v392_v42 }
0x1523   :  { %v1806_v10 = vpop.permute.xlu1 %1805 }
0x1524   :  { %2277 = vtanh.f32 %v1809_v11  ;;  %v1810_v55 = vadd.f32 %v1806_v10, %v394_v18 }
0x1525   :  { %v1738_v31 = vpop.permute.xlu0 %1737 }
0x1526   :  { %2279 = vtanh.f32 %v1810_v55  ;;  %v1743_v46 = vadd.f32 %v2315_v39, %v1738_v31 }
0x1527   :  { %v1740_v54 = vpop.permute.xlu1 %1739 }
0x1528   :  { %2281 = vtanh.f32 %v1743_v46  ;;  %v1744_v59 = vadd.f32 %v2316_v4, %v1740_v54  ;;  %v1747_v4 = vsub.f32 1.0, %v3015_v6 }
0x152a   :  { %2283 = vtanh.f32 %v1744_v59 }
0x152b   :  { %2285 = vpow2.f32 %v1934_v62 }
0x152c   :  { %2287 = vpow2.f32 %v1935_v1 }
0x152e   :  { %v2278_v34 = vpop.eup %2277 }
0x152f   :  { %1817 = vrot.lane.b32.xlu0 %v2278_v34, %s2320_s4 }
0x1530   :  { %v2280_v36 = vpop.eup %2279 }
0x1531   :  { %1819 = vrot.lane.b32.xlu1 %v2280_v36, %s2320_s4 }
0x1532   :  { %v2282_v26 = vpop.eup %2281 }
0x1533   :  { %1751 = vrot.lane.b32.xlu0 %v2282_v26, %s2320_s4 }
0x1534   :  { %v2284_v58 = vpop.eup %2283 }
0x1535   :  { %1753 = vrot.lane.b32.xlu1 %v2284_v58, %s2320_s4  ;;  %v2286_v5 = vpop.eup %2285 }
0x1536   :  { %v2288_v7 = vpop.eup %2287  ;;  %v1785_v30 = vadd.f32 1.0, %v2286_v5 }
0x1537   :  { %v1786_v37 = vadd.f32 1.0, %v2288_v7 }
0x1538   :  { %2289 = vrcp.f32 %v1785_v30 }
0x1539   :  { %2291 = vrcp.f32 %v1786_v37 }
0x1542   :  { %v2290_v63 = vpop.eup %2289 }
0x1543   :  { %v2292_v0 = vpop.eup %2291  ;;  %v1813_v48 = vsub.f32 1.0, %v2290_v63  ;;  %v1825_v47 = vmul.f32 %v2290_v63, %v2989_v29  ;;  %v1759_v29 = vmul.f32 %v3015_v6, %v2981_v8 }
0x1544   :  { %v1814_v60 = vsub.f32 1.0, %v2292_v0  ;;  %v1826_v17 = vmul.f32 %v2292_v0, %v2991_v49 }
0x15a1   :  { %v1818_v33 = vpop.permute.xlu0 %1817 }
0x15a2   :  { %v1823_v50 = vmul.f32 %v1818_v33, %v1813_v48 }
0x15a3   :  { %v1820_v40 = vpop.permute.xlu1 %1819 }
0x15a4   :  { %v1827_v45 = vadd.f32 %v1825_v47, %v1823_v50  ;;  %v1824_v39 = vmul.f32 %v1820_v40, %v1814_v60 }
0x15a5   :  { %v1752_v32 = vpop.permute.xlu0 %1751 }
0x15a6   :  { %v1828_v41 = vadd.f32 %v1826_v17, %v1824_v39  ;;  %1831 = vrot.lane.b32.xlu0 %v1827_v45, %s2321_s10  ;;  %v1757_v3 = vmul.f32 %v1752_v32, %v1747_v4 }
0x15a7   :  { %v1754_v52 = vpop.permute.xlu1 %1753 }
0x15a8   :  { %1833 = vrot.lane.b32.xlu1 %v1828_v41, %s2321_s10  ;;  %v1758_v57 = vmul.f32 %v1754_v52, %v1748_v35  ;;  %v1761_v38 = vadd.f32 %v1759_v29, %v1757_v3 }
0x15aa   :  { %v1762_v9 = vadd.f32 %v1760_v14, %v1758_v57 }
0x1618   :  { %v1832_v49 = vpop.permute.xlu0 %1831 }
0x1619   :  { %v1837_v51 = vmax.f32 %v1761_v38, %v1832_v49 }
0x161a   :  { %v1834_v56 = vpop.permute.xlu1 %1833 }
0x161b   :  { %v1838_v27 = vmax.f32 %v1762_v9, %v1834_v56  ;;  %1841 = vrot.lane.b32.xlu0 %v1837_v51, %s2320_s4 }
0x161d   :  { %1843 = vrot.lane.b32.xlu1 %v1838_v27, %s2320_s4 }
0x168d   :  { %v1842_v25 = vpop.permute.xlu0 %1841 }
0x168e   :  { %1847 = vst.msk [vmem:[%s3050_s5] sm:$0xff] %vm113_vm0, %v1842_v25 }
0x168f   :  { %v1844_v15 = vpop.permute.xlu1 %1843 }
0x1690   :  { %1848 = vst.msk [vmem:[%s3050_s5 + $0x8] sm:$0xff] %vm113_vm0, %v1844_v15 }

</bundles_post_ra>
